<compile_context>
chip_gen: v6e
topology: v6e:2x2x1
jax: 0.10.0
libtpu: 0.0.40
codegen_flags: <defaults>
</compile_context>

<pallas_src>
import functools

import jax
import jax.numpy as jnp
import numpy as np
from jax.experimental import pallas as pl
from jax.experimental.pallas import tpu as pltpu


# ----------------------------- Pallas kernel -------------------------------


def _deconv3x3_kernel(x_ref, w_ref, b_ref, o_ref, patch_ref, *, TH, W, Cin,
                      Cout_pad):
    # x_ref     : (1, H+2, W+2, Cin)   padded input for one batch element
    # w_ref     : (9*Cin, Cout_pad)    fused weight, K index = (kh*3+kw)*Cin+ci
    # b_ref     : (1, Cout_pad)        fused bias (f32, zero-padded)
    # o_ref     : (1, TH, W, Cout_pad) output tile (lane-dense minor dim)
    # patch_ref : (TH*W, 9*Cin)        im2col scratch (compute dtype)
    hi = pl.program_id(1)
    h0 = pl.multiple_of(hi * TH, TH)

    # Stage the 9 shifted taps into the im2col scratch (K = tap-major, ci-minor).
    for k in range(9):
        dy, dx = divmod(k, 3)
        tap = x_ref[0, pl.ds(h0 + dy, TH), dx:dx + W, :]        # (TH, W, Cin)
        patch_ref[:, k * Cin:(k + 1) * Cin] = tap.reshape(TH * W, Cin)

    # One MXU matmul: M = TH*W, K = 9*Cin, N = Cout_pad; accumulate in f32.
    acc = jnp.dot(patch_ref[...], w_ref[...],
                  preferred_element_type=jnp.float32)
    acc = acc + b_ref[...]
    o_ref[0] = acc.reshape(TH, W, Cout_pad).astype(o_ref.dtype)


def _choose_tile_h(H, W, Cin, Cout_pad):
    """Largest divisor of H whose per-step compute working set fits a budget."""
    budget = 8 * 1024 * 1024            # im2col patch + f32 acc + 2x out block
    per_row = W * (9 * Cin + 3 * Cout_pad) * 4
    for cand in range(H, 0, -1):
        if H % cand == 0 and cand * per_row <= budget:
            return cand
    return 1


def deconv_pallas_nhwc(x_nhwc, w_oihw, bias, *, compute_dtype=jnp.float32):
    """Fused 3x3 conv (stride 1, pad 1, bias) on NHWC input via Pallas."""
    N, H, W, Cin = x_nhwc.shape
    Cout = w_oihw.shape[0]
    out_dtype = x_nhwc.dtype
    Cout_pad = ((Cout + 127) // 128) * 128      # lane-dense output minor dim

    # Zero-pad spatially by 1 and cast activations to the compute dtype.
    x_pad = jnp.pad(x_nhwc, ((0, 0), (1, 1), (1, 1), (0, 0))).astype(compute_dtype)

    # OIHW -> (9*Cin, Cout_pad): K index = (kh*3 + kw)*Cin + ci, matching the
    # kernel's im2col ordering; zero-pad the Cout columns to lane width.
    w_mat = jnp.transpose(w_oihw, (2, 3, 1, 0)).reshape(9 * Cin, Cout)
    w_mat = jnp.pad(w_mat, ((0, 0), (0, Cout_pad - Cout))).astype(compute_dtype)
    b_pad = jnp.pad(bias, (0, Cout_pad - Cout)).astype(jnp.float32)
    b_pad = b_pad.reshape(1, Cout_pad)

    TH = _choose_tile_h(H, W, Cin, Cout_pad)
    nh = H // TH

    kernel = functools.partial(_deconv3x3_kernel, TH=TH, W=W, Cin=Cin,
                               Cout_pad=Cout_pad)

    out_pad = pl.pallas_call(
        kernel,
        out_shape=jax.ShapeDtypeStruct((N, H, W, Cout_pad), out_dtype),
        grid_spec=pltpu.PrefetchScalarGridSpec(
            num_scalar_prefetch=0,
            grid=(N, nh),
            in_specs=[
                # Full padded image per n (block index constant along h ->
                # fetched once per batch element).
                pl.BlockSpec((1, H + 2, W + 2, Cin), lambda n, h: (n, 0, 0, 0)),
                pl.BlockSpec((9 * Cin, Cout_pad), lambda n, h: (0, 0)),
                pl.BlockSpec((1, Cout_pad), lambda n, h: (0, 0)),
            ],
            out_specs=pl.BlockSpec((1, TH, W, Cout_pad),
                                   lambda n, h: (n, h, 0, 0)),
            scratch_shapes=[pltpu.VMEM((TH * W, 9 * Cin), compute_dtype)],
        ),
        compiler_params=pltpu.CompilerParams(
            dimension_semantics=("parallel", "arbitrary"),
            vmem_limit_bytes=48 * 1024 * 1024,
        ),
    )(x_pad, w_mat, b_pad)

    return out_pad[..., :Cout]


def deconv_pallas(x_nchw, w_oihw, bias, *, compute_dtype=jnp.float32):
    """NCHW boundary for PyTorch parity.  NHWC models should call
    deconv_pallas_nhwc directly and skip both transposes."""
    x_nhwc = jnp.transpose(x_nchw, (0, 2, 3, 1))
    out_nhwc = deconv_pallas_nhwc(x_nhwc, w_oihw, bias,
                                  compute_dtype=compute_dtype)
    return jnp.transpose(out_nhwc, (0, 3, 1, 2))


# -------------------- DEConv weight fusion (plain JAX glue) -----------------


def make_deconv_params(dim, key):
    """Deterministic init of the 5 sub-conv params (same shapes as the
    PyTorch module __init__)."""
    ks = jax.random.split(key, 10)
    scale = 0.1
    return dict(
        w_cd=jax.random.normal(ks[0], (dim, dim, 3, 3), jnp.float32) * scale,
        b_cd=jax.random.normal(ks[1], (dim,), jnp.float32) * scale,
        w_hd=jax.random.normal(ks[2], (dim, dim, 3), jnp.float32) * scale,   # Conv1d
        b_hd=jax.random.normal(ks[3], (dim,), jnp.float32) * scale,
        w_vd=jax.random.normal(ks[4], (dim, dim, 3), jnp.float32) * scale,   # Conv1d
        b_vd=jax.random.normal(ks[5], (dim,), jnp.float32) * scale,
        w_ad=jax.random.normal(ks[6], (dim, dim, 3, 3), jnp.float32) * scale,
        b_ad=jax.random.normal(ks[7], (dim,), jnp.float32) * scale,
        w_5=jax.random.normal(ks[8], (dim, dim, 3, 3), jnp.float32) * scale,
        b_5=jax.random.normal(ks[9], (dim,), jnp.float32) * scale,
    )


def fuse_deconv_weights(p, theta=1.0):
    dim = p["w_cd"].shape[0]

    # Conv2d_cd: center tap = w[4] - sum(all 9 taps)
    wc = p["w_cd"].reshape(dim, dim, 9)
    w1 = wc.at[:, :, 4].set(wc[:, :, 4] - wc.sum(axis=2))

    # Conv2d_hd: taps [0,3,6] = w, taps [2,5,8] = -w   (Conv1d weight)
    w2 = jnp.zeros((dim, dim, 9), jnp.float32)
    w2 = w2.at[:, :, jnp.array([0, 3, 6])].set(p["w_hd"])
    w2 = w2.at[:, :, jnp.array([2, 5, 8])].set(-p["w_hd"])

    # Conv2d_vd: taps [0,1,2] = w, taps [6,7,8] = -w
    w3 = jnp.zeros((dim, dim, 9), jnp.float32)
    w3 = w3.at[:, :, jnp.array([0, 1, 2])].set(p["w_vd"])
    w3 = w3.at[:, :, jnp.array([6, 7, 8])].set(-p["w_vd"])

    # Conv2d_ad: w - theta * w[:, :, perm]
    perm = jnp.array([3, 0, 1, 6, 4, 2, 7, 8, 5])
    wa = p["w_ad"].reshape(dim, dim, 9)
    w4 = wa - theta * wa[:, :, perm]

    w5 = p["w_5"].reshape(dim, dim, 9)

    w = (w1 + w2 + w3 + w4 + w5).reshape(dim, dim, 3, 3)   # OIHW
    b = p["b_cd"] + p["b_hd"] + p["b_vd"] + p["b_ad"] + p["b_5"]
    return w, b


@functools.partial(jax.jit, static_argnames=("compute_dtype",))
def deconv_forward(x_nchw, params, *, compute_dtype=jnp.float32):
    w, b = fuse_deconv_weights(params)
    return deconv_pallas(x_nchw, w, b, compute_dtype=compute_dtype)


# --------------------------------- main -------------------------------------


if __name__ == "__main__":
    key = jax.random.PRNGKey(0)
    k_x, k_p = jax.random.split(key)

    N, C, H, W = 2, 4, 16, 16
    x = jax.random.normal(k_x, (N, C, H, W), jnp.float32)
    params = make_deconv_params(C, k_p)

    w, b = fuse_deconv_weights(params)

    # --- f32 path: tight cross-check against XLA's conv -------------------
    out_f32 = jax.block_until_ready(deconv_forward(x, params))
    ref_f32 = jax.lax.conv_general_dilated(
        x, w, window_strides=(1, 1), padding=((1, 1), (1, 1)),
        dimension_numbers=("NCHW", "OIHW", "NCHW"),
    ) + b.reshape(1, C, 1, 1)
    np.testing.assert_allclose(np.asarray(out_f32), np.asarray(ref_f32),
                               rtol=1e-5, atol=1e-5)

    # --- bf16 MXU path (recommended on v6e/v7x), f32 accumulation ----------
    out_bf16 = jax.block_until_ready(
        deconv_forward(x, params, compute_dtype=jnp.bfloat16))
    ref_bf16 = jax.lax.conv_general_dilated(
        x.astype(jnp.bfloat16), w.astype(jnp.bfloat16),
        window_strides=(1, 1), padding=((1, 1), (1, 1)),
        dimension_numbers=("NCHW", "OIHW", "NCHW"),
        preferred_element_type=jnp.float32,
    ) + b.reshape(1, C, 1, 1)
    np.testing.assert_allclose(np.asarray(out_bf16), np.asarray(ref_bf16),
                               rtol=1e-2, atol=1e-2)

    print("KERNEL_OK")
</pallas_src>

<mosaic_0001>
module attributes {stable_mosaic.version = 11 : i64} {
  func.func @_deconv3x3_kernel(%arg0: i32, %arg1: i32, %arg2: memref<1x18x18x4xf32, #tpu.memory_space<vmem>>, %arg3: memref<36x128xf32, #tpu.memory_space<vmem>>, %arg4: memref<1x128xf32, #tpu.memory_space<vmem>>, %arg5: memref<1x16x16x128xf32, #tpu.memory_space<vmem>>, %arg6: memref<256x36xf32, #tpu.memory_space<vmem>>) attributes {dimension_semantics = [#tpu.dimension_semantics<parallel>, #tpu.dimension_semantics<arbitrary>], iteration_bounds = array<i64: 2, 1>, scalar_prefetch = 0 : i64, scratch_operands = 1 : i64, tpu.core_type = #tpu.core_type<tc>, window_params = [{transform_indices = @transform_0, window_bounds = array<i64: 1, 18, 18, 4>}, {pipeline_mode = #tpu.pipeline_mode<synchronous>, transform_indices = @transform_1, window_bounds = array<i64: 36, 128>}, {pipeline_mode = #tpu.pipeline_mode<synchronous>, transform_indices = @transform_2, window_bounds = array<i64: 1, 128>}, {transform_indices = @transform_3, window_bounds = array<i64: 1, 16, 16, 128>}]} {
    %c16_i32 = arith.constant 16 : i32
    %0 = arith.muli %arg1, %c16_i32 : i32
    %1 = tpu.assume_multiple %0, 16 : i32
    %c0_i32 = arith.constant 0 : i32
    %2 = arith.addi %1, %c0_i32 : i32
    %c0 = arith.constant 0 : index
    %3 = arith.index_cast %2 : i32 to index
    %c0_0 = arith.constant 0 : index
    %c0_1 = arith.constant 0 : index
    %4 = vector.load %arg2[%c0, %3, %c0_0, %c0_1] : memref<1x18x18x4xf32, #tpu.memory_space<vmem>>, vector<1x16x16x4xf32>
    %5 = vector.shape_cast %4 : vector<1x16x16x4xf32> to vector<16x16x4xf32>
    %6 = vector.shape_cast %5 : vector<16x16x4xf32> to vector<256x4xf32>
    %c0_2 = arith.constant 0 : index
    %c0_3 = arith.constant 0 : index
    %7 = vector.load %arg6[%c0_2, %c0_3] : memref<256x36xf32, #tpu.memory_space<vmem>>, vector<256x4xf32>
    tpu.vector_store %arg6[%c0_2, %c0_3], %6 {strides = array<i32>} : memref<256x36xf32, #tpu.memory_space<vmem>>, vector<256x4xf32>,
    %c0_i32_4 = arith.constant 0 : i32
    %8 = arith.addi %1, %c0_i32_4 : i32
    %c0_5 = arith.constant 0 : index
    %9 = arith.index_cast %8 : i32 to index
    %c1 = arith.constant 1 : index
    %c0_6 = arith.constant 0 : index
    %10 = vector.load %arg2[%c0_5, %9, %c1, %c0_6] : memref<1x18x18x4xf32, #tpu.memory_space<vmem>>, vector<1x16x16x4xf32>
    %11 = vector.shape_cast %10 : vector<1x16x16x4xf32> to vector<16x16x4xf32>
    %12 = vector.shape_cast %11 : vector<16x16x4xf32> to vector<256x4xf32>
    %c0_7 = arith.constant 0 : index
    %c4 = arith.constant 4 : index
    %13 = vector.load %arg6[%c0_7, %c4] : memref<256x36xf32, #tpu.memory_space<vmem>>, vector<256x4xf32>
    tpu.vector_store %arg6[%c0_7, %c4], %12 {strides = array<i32>} : memref<256x36xf32, #tpu.memory_space<vmem>>, vector<256x4xf32>,
    %c0_i32_8 = arith.constant 0 : i32
    %14 = arith.addi %1, %c0_i32_8 : i32
    %c0_9 = arith.constant 0 : index
    %15 = arith.index_cast %14 : i32 to index
    %c2 = arith.constant 2 : index
    %c0_10 = arith.constant 0 : index
    %16 = vector.load %arg2[%c0_9, %15, %c2, %c0_10] : memref<1x18x18x4xf32, #tpu.memory_space<vmem>>, vector<1x16x16x4xf32>
    %17 = vector.shape_cast %16 : vector<1x16x16x4xf32> to vector<16x16x4xf32>
    %18 = vector.shape_cast %17 : vector<16x16x4xf32> to vector<256x4xf32>
    %c0_11 = arith.constant 0 : index
    %c8 = arith.constant 8 : index
    %19 = vector.load %arg6[%c0_11, %c8] : memref<256x36xf32, #tpu.memory_space<vmem>>, vector<256x4xf32>
    tpu.vector_store %arg6[%c0_11, %c8], %18 {strides = array<i32>} : memref<256x36xf32, #tpu.memory_space<vmem>>, vector<256x4xf32>,
    %c1_i32 = arith.constant 1 : i32
    %20 = arith.addi %1, %c1_i32 : i32
    %c0_12 = arith.constant 0 : index
    %21 = arith.index_cast %20 : i32 to index
    %c0_13 = arith.constant 0 : index
    %c0_14 = arith.constant 0 : index
    %22 = vector.load %arg2[%c0_12, %21, %c0_13, %c0_14] : memref<1x18x18x4xf32, #tpu.memory_space<vmem>>, vector<1x16x16x4xf32>
    %23 = vector.shape_cast %22 : vector<1x16x16x4xf32> to vector<16x16x4xf32>
    %24 = vector.shape_cast %23 : vector<16x16x4xf32> to vector<256x4xf32>
    %c0_15 = arith.constant 0 : index
    %c12 = arith.constant 12 : index
    %25 = vector.load %arg6[%c0_15, %c12] : memref<256x36xf32, #tpu.memory_space<vmem>>, vector<256x4xf32>
    tpu.vector_store %arg6[%c0_15, %c12], %24 {strides = array<i32>} : memref<256x36xf32, #tpu.memory_space<vmem>>, vector<256x4xf32>,
    %c1_i32_16 = arith.constant 1 : i32
    %26 = arith.addi %1, %c1_i32_16 : i32
    %c0_17 = arith.constant 0 : index
    %27 = arith.index_cast %26 : i32 to index
    %c1_18 = arith.constant 1 : index
    %c0_19 = arith.constant 0 : index
    %28 = vector.load %arg2[%c0_17, %27, %c1_18, %c0_19] : memref<1x18x18x4xf32, #tpu.memory_space<vmem>>, vector<1x16x16x4xf32>
    %29 = vector.shape_cast %28 : vector<1x16x16x4xf32> to vector<16x16x4xf32>
    %30 = vector.shape_cast %29 : vector<16x16x4xf32> to vector<256x4xf32>
    %c0_20 = arith.constant 0 : index
    %c16 = arith.constant 16 : index
    %31 = vector.load %arg6[%c0_20, %c16] : memref<256x36xf32, #tpu.memory_space<vmem>>, vector<256x4xf32>
    tpu.vector_store %arg6[%c0_20, %c16], %30 {strides = array<i32>} : memref<256x36xf32, #tpu.memory_space<vmem>>, vector<256x4xf32>,
    %c1_i32_21 = arith.constant 1 : i32
    %32 = arith.addi %1, %c1_i32_21 : i32
    %c0_22 = arith.constant 0 : index
    %33 = arith.index_cast %32 : i32 to index
    %c2_23 = arith.constant 2 : index
    %c0_24 = arith.constant 0 : index
    %34 = vector.load %arg2[%c0_22, %33, %c2_23, %c0_24] : memref<1x18x18x4xf32, #tpu.memory_space<vmem>>, vector<1x16x16x4xf32>
    %35 = vector.shape_cast %34 : vector<1x16x16x4xf32> to vector<16x16x4xf32>
    %36 = vector.shape_cast %35 : vector<16x16x4xf32> to vector<256x4xf32>
    %c0_25 = arith.constant 0 : index
    %c20 = arith.constant 20 : index
    %37 = vector.load %arg6[%c0_25, %c20] : memref<256x36xf32, #tpu.memory_space<vmem>>, vector<256x4xf32>
    tpu.vector_store %arg6[%c0_25, %c20], %36 {strides = array<i32>} : memref<256x36xf32, #tpu.memory_space<vmem>>, vector<256x4xf32>,
    %c2_i32 = arith.constant 2 : i32
    %38 = arith.addi %1, %c2_i32 : i32
    %c0_26 = arith.constant 0 : index
    %39 = arith.index_cast %38 : i32 to index
    %c0_27 = arith.constant 0 : index
    %c0_28 = arith.constant 0 : index
    %40 = vector.load %arg2[%c0_26, %39, %c0_27, %c0_28] : memref<1x18x18x4xf32, #tpu.memory_space<vmem>>, vector<1x16x16x4xf32>
    %41 = vector.shape_cast %40 : vector<1x16x16x4xf32> to vector<16x16x4xf32>
    %42 = vector.shape_cast %41 : vector<16x16x4xf32> to vector<256x4xf32>
    %c0_29 = arith.constant 0 : index
    %c24 = arith.constant 24 : index
    %43 = vector.load %arg6[%c0_29, %c24] : memref<256x36xf32, #tpu.memory_space<vmem>>, vector<256x4xf32>
    tpu.vector_store %arg6[%c0_29, %c24], %42 {strides = array<i32>} : memref<256x36xf32, #tpu.memory_space<vmem>>, vector<256x4xf32>,
    %c2_i32_30 = arith.constant 2 : i32
    %44 = arith.addi %1, %c2_i32_30 : i32
    %c0_31 = arith.constant 0 : index
    %45 = arith.index_cast %44 : i32 to index
    %c1_32 = arith.constant 1 : index
    %c0_33 = arith.constant 0 : index
    %46 = vector.load %arg2[%c0_31, %45, %c1_32, %c0_33] : memref<1x18x18x4xf32, #tpu.memory_space<vmem>>, vector<1x16x16x4xf32>
    %47 = vector.shape_cast %46 : vector<1x16x16x4xf32> to vector<16x16x4xf32>
    %48 = vector.shape_cast %47 : vector<16x16x4xf32> to vector<256x4xf32>
    %c0_34 = arith.constant 0 : index
    %c28 = arith.constant 28 : index
    %49 = vector.load %arg6[%c0_34, %c28] : memref<256x36xf32, #tpu.memory_space<vmem>>, vector<256x4xf32>
    tpu.vector_store %arg6[%c0_34, %c28], %48 {strides = array<i32>} : memref<256x36xf32, #tpu.memory_space<vmem>>, vector<256x4xf32>,
    %c2_i32_35 = arith.constant 2 : i32
    %50 = arith.addi %1, %c2_i32_35 : i32
    %c0_36 = arith.constant 0 : index
    %51 = arith.index_cast %50 : i32 to index
    %c2_37 = arith.constant 2 : index
    %c0_38 = arith.constant 0 : index
    %52 = vector.load %arg2[%c0_36, %51, %c2_37, %c0_38] : memref<1x18x18x4xf32, #tpu.memory_space<vmem>>, vector<1x16x16x4xf32>
    %53 = vector.shape_cast %52 : vector<1x16x16x4xf32> to vector<16x16x4xf32>
    %54 = vector.shape_cast %53 : vector<16x16x4xf32> to vector<256x4xf32>
    %c0_39 = arith.constant 0 : index
    %c32 = arith.constant 32 : index
    %55 = vector.load %arg6[%c0_39, %c32] : memref<256x36xf32, #tpu.memory_space<vmem>>, vector<256x4xf32>
    tpu.vector_store %arg6[%c0_39, %c32], %54 {strides = array<i32>} : memref<256x36xf32, #tpu.memory_space<vmem>>, vector<256x4xf32>,
    %c0_40 = arith.constant 0 : index
    %c0_41 = arith.constant 0 : index
    %56 = vector.load %arg6[%c0_40, %c0_41] : memref<256x36xf32, #tpu.memory_space<vmem>>, vector<256x36xf32>
    %c0_42 = arith.constant 0 : index
    %c0_43 = arith.constant 0 : index
    %57 = vector.load %arg3[%c0_42, %c0_43] : memref<36x128xf32, #tpu.memory_space<vmem>>, vector<36x128xf32>
    %cst = arith.constant dense<0.000000e+00> : vector<256x128xf32>
    %58 = tpu.matmul %56, %57, %cst {dimension_numbers = #tpu.dot_dimension_numbers<[1], [0], [0], [1], [0, 0, 1, 1], [], []>} : vector<256x36xf32>, vector<36x128xf32>, vector<256x128xf32> -> vector<256x128xf32>
    %c0_44 = arith.constant 0 : index
    %c0_45 = arith.constant 0 : index
    %59 = vector.load %arg4[%c0_44, %c0_45] : memref<1x128xf32, #tpu.memory_space<vmem>>, vector<1x128xf32>
    %60 = vector.broadcast %59 : vector<1x128xf32> to vector<256x128xf32>
    %61 = arith.addf %58, %60 : vector<256x128xf32>
    %62 = vector.shape_cast %61 : vector<256x128xf32> to vector<16x16x128xf32>
    %c0_46 = arith.constant 0 : index
    %c0_47 = arith.constant 0 : index
    %c0_48 = arith.constant 0 : index
    %c0_49 = arith.constant 0 : index
    %63 = vector.load %arg5[%c0_46, %c0_47, %c0_48, %c0_49] : memref<1x16x16x128xf32, #tpu.memory_space<vmem>>, vector<1x16x16x128xf32>
    %64 = vector.shape_cast %63 : vector<1x16x16x128xf32> to vector<16x16x128xf32>
    %65 = vector.shape_cast %62 : vector<16x16x128xf32> to vector<1x16x16x128xf32>
    tpu.vector_store %arg5[%c0_46, %c0_47, %c0_48, %c0_49], %65 {strides = array<i32>} : memref<1x16x16x128xf32, #tpu.memory_space<vmem>>, vector<1x16x16x128xf32>,
    return
  }
  func.func @transform_0(%arg0: i32, %arg1: i32) -> (i32, i32, i32, i32) {
    %c0_i32 = arith.constant 0 : i32
    %c0_i32_0 = arith.constant 0 : i32
    %c0_i32_1 = arith.constant 0 : i32
    %c0_i32_2 = arith.constant 0 : i32
    return %arg0, %c0_i32, %c0_i32_0, %c0_i32_1 : i32, i32, i32, i32
  }
  func.func @transform_1(%arg0: i32, %arg1: i32) -> (i32, i32) {
    %c0_i32 = arith.constant 0 : i32
    %c0_i32_0 = arith.constant 0 : i32
    %c0_i32_1 = arith.constant 0 : i32
    return %c0_i32, %c0_i32_0 : i32, i32
  }
  func.func @transform_2(%arg0: i32, %arg1: i32) -> (i32, i32) {
    %c0_i32 = arith.constant 0 : i32
    %c0_i32_0 = arith.constant 0 : i32
    %c0_i32_1 = arith.constant 0 : i32
    return %c0_i32, %c0_i32_0 : i32, i32
  }
  func.func @transform_3(%arg0: i32, %arg1: i32) -> (i32, i32, i32, i32) {
    %c0_i32 = arith.constant 0 : i32
    %c0_i32_0 = arith.constant 0 : i32
    %c0_i32_1 = arith.constant 0 : i32
    return %arg0, %arg1, %c0_i32, %c0_i32_0 : i32, i32, i32, i32
  }
}

</mosaic_0001>

<bundles_post_ra>
// kernel: deconv_forward.1
= control target key start
LH: loop header
LB: loop body
LE: loop exit
PB: predicated region body
PF: predicated region fallthrough
CT: control target
= control target key end

     0   :  { %s2740_s12 = smov 0   ;;  %s2742_s13 = smov 0   ;;  %s3883_s0 = inlined_call_operand.vmem [shape: f32[2,18,18,4], index: 0, kind: input, shape index: {}]   ;;  %s3884_s1 = inlined_call_operand.vmem [shape: f32[36,128], index: 1, kind: input, shape index: {}]   ;;  %s3885_s2 = inlined_call_operand.vmem [shape: f32[1,128], index: 2, kind: input, shape index: {}]   ;;  %s3886_s3 = inlined_call_operand.vmem [shape: f32[2,16,16,128], index: 3, kind: output, shape index: {}]  }
   0x1   :  { %s2744_s14 = smov 0  }
   0x2 LB: > { %s25_s15 = sadd.s32 1, %s2706_s13  ;;  %p2317_p0 = scmp.ge.s32.totalorder %s2710_s14, 1  ;;  %s2710_s14 = sphi %s2744_s14, %s13_s14   ;;  %s2706_s13 = sphi %s2742_s13, %s3919_s13   ;;  %s2702_s12 = sphi %s2740_s12, %s3918_s12  }
   0x3   : > { %p27_p1 = scmp.ge.s32.totalorder %s25_s15, 2  ;;  %p151_p2 = scmp.lt.s32.totalorder %s2710_s14, 3 }
   0x5   : > { %s3921_s15 = smov (%p27_p1, %s25_s15), 0  ;;  %p152_p3 = pnand %p2317_p0, %p151_p2 }
   0x7   : > { %155 = sbr.rel (%p152_p3) target bundleno = 849 (0x351), region = 32 }
   0xc   : > { %p180_p4 = scmp.lt.s32.totalorder %s2702_s12, 1  ;;  %s2712_s20 = smov 4   ;;  %vm231_vm0 = vcmask 31744   ;;  %vm424_vm1 = vcmask 64544   ;;  %vm617_vm2 = vcmask 97344   ;;  %vm813_vm3 = vcmask 130144  }
   0xd   : > { %s2713_s21 = smov 8   ;;  %s2714_s22 = smov 12   ;;  %vm1955_vm4 = vcmask 1043456   ;;  %vm1006_vm5 = vcmask 162944   ;;  %vm1199_vm6 = vcmask 195744   ;;  %vm1395_vm7 = vcmask 228544  }
   0xe   : > { %s3923_s12 = smov (!%p180_p4, %s2702_s12), 1  ;;  %s2715_s23 = smov 16   ;;  %vm1588_vm8 = vcmask 261344   ;;  %vm1781_vm9 = vcmask 294144   ;;  %vm1858_vm10 = vcmask 293888  }
   0xf   : > { %s2655_s16 = smul.u32 432, %s3923_s12  ;;  %s2716_s24 = smov 20  }
  0x10   : > { %s2717_s25 = smov 24   ;;  %s2718_s26 = smov 28  }
  0x11   : > { %s2764_s19 = scalar_lea.vmem %s3883_s0, %s2655_s16  ;;  %s2719_s4 = smov 32  }
  0x12   : > { %v2767_v0 = vld [vmem:[%s2764_s19 + $0x19] sm:$0xff]  ;;  %v264_v1 = vld [vmem:[%s2764_s19 + $0x1] sm:$0xff]  ;;  %v265_v3 = vld [vmem:[%s2764_s19 + $0x9] sm:$0xff]  ;;  %s2549_s11 = sshll.u32 %s3923_s12, 8 }
  0x13   : > { %332 = vrot.lane.b32.xlu1 %v2767_v0, %s2712_s20  ;;  %328 = vrot.lane.b32.xlu0 %v264_v1, %s2712_s20  ;;  %v2774_v2 = vld [vmem:[%s2764_s19 + $0x21] sm:$0xff]  ;;  %v2781_v4 = vld [vmem:[%s2764_s19 + $0x39] sm:$0xff] }
  0x14   : > { %v2784_v5 = vld [vmem:[%s2764_s19 + $0x31] sm:$0xff]  ;;  %v2794_v7 = vld [vmem:[%s2764_s19 + $0x49] sm:$0xff]  ;;  %v2804_v9 = vld [vmem:[%s2764_s19 + $0x61] sm:$0xff] }
  0x15   : > { %v2791_v6 = vld [vmem:[%s2764_s19 + $0x51] sm:$0xff]  ;;  %v2801_v8 = vld [vmem:[%s2764_s19 + $0x69] sm:$0xff]  ;;  %v2811_v10 = vld [vmem:[%s2764_s19 + $0x81] sm:$0xff] }
  0x16   : > { %v2814_v11 = vld [vmem:[%s2764_s19 + $0x79] sm:$0xff]  ;;  %v2828_v15 = vld [vmem:[%s2764_s19 + $0x91] sm:$0xff]  ;;  %v200_v17 = vld [vmem:[%s2764_s19 + $0x8] sm:$0xff] }
  0x17   : > { %334 = vrot.lane.b32.xlu1 %v2774_v2, %s2712_s20  ;;  %330 = vrot.lane.b32.xlu0 %v265_v3, %s2712_s20  ;;  %v2821_v12 = vld [vmem:[%s2764_s19 + $0x18] sm:$0xff]  ;;  %v199_v13 = vld [vmem:[%s2764_s19] sm:$0xff]  ;;  %233 = vst.msk [vmem:[#allocation2 + $0x8] sm:$0xff] %vm231_vm0, %v200_v17 }
  0x18   : > { %v2825_v14 = vld [vmem:[%s2764_s19 + $0x99] sm:$0xff]  ;;  %234 = vst.msk [vmem:[#allocation2 + $0x10] sm:$0xff] %vm231_vm0, %v2821_v12  ;;  %232 = vst.msk [vmem:[#allocation2] sm:$0xff] %vm231_vm0, %v199_v13  ;;  %v279_v18 = vld [vmem:[%s2764_s19 + $0xb1] sm:$0xff] }
  0x19   : > { %v2834_v16 = vld [vmem:[%s2764_s19 + $0x20] sm:$0xff]  ;;  %v2842_v19 = vld [vmem:[%s2764_s19 + $0x38] sm:$0xff]  ;;  %v2845_v20 = vld [vmem:[%s2764_s19 + $0x30] sm:$0xff] }
  0x1a   : > { %235 = vst.msk [vmem:[#allocation2 + $0x18] sm:$0xff] %vm231_vm0, %v2834_v16  ;;  %v278_v21 = vld [vmem:[%s2764_s19 + $0xa9] sm:$0xff]  ;;  %237 = vst.msk [vmem:[#allocation2 + $0x28] sm:$0xff] %vm231_vm0, %v2842_v19  ;;  %v2868_v25 = vld [vmem:[%s2764_s19 + $0x60] sm:$0xff] }
  0x1b   : > { %338 = vrot.lane.b32.xlu1 %v2781_v4, %s2712_s20  ;;  %336 = vrot.lane.b32.xlu0 %v2784_v5, %s2712_s20  ;;  %236 = vst.msk [vmem:[#allocation2 + $0x20] sm:$0xff] %vm231_vm0, %v2845_v20  ;;  %v2857_v22 = vld [vmem:[%s2764_s19 + $0x50] sm:$0xff]  ;;  %v2862_v23 = vld [vmem:[%s2764_s19 + $0x48] sm:$0xff]  ;;  %240 = vst.msk [vmem:[#allocation2 + $0x40] sm:$0xff] %vm231_vm0, %v2868_v25 }
  0x1c   : > { %239 = vst.msk [vmem:[#allocation2 + $0x38] sm:$0xff] %vm231_vm0, %v2857_v22  ;;  %v2865_v24 = vld [vmem:[%s2764_s19 + $0x68] sm:$0xff]  ;;  %238 = vst.msk [vmem:[#allocation2 + $0x30] sm:$0xff] %vm231_vm0, %v2862_v23  ;;  %v2877_v26 = vld [vmem:[%s2764_s19 + $0x80] sm:$0xff] }
  0x1d   : > { %241 = vst.msk [vmem:[#allocation2 + $0x48] sm:$0xff] %vm231_vm0, %v2865_v24  ;;  %v2880_v27 = vld [vmem:[%s2764_s19 + $0x78] sm:$0xff]  ;;  %v281_v29 = vld [vmem:[%s2764_s19 + $0xc9] sm:$0xff]  ;;  %v280_v30 = vld [vmem:[%s2764_s19 + $0xc1] sm:$0xff] }
  0x1e   : > { %v2883_v28 = vld [vmem:[%s2764_s19 + $0x98] sm:$0xff]  ;;  %243 = vst.msk [vmem:[#allocation2 + $0x58] sm:$0xff] %vm231_vm0, %v2877_v26  ;;  %242 = vst.msk [vmem:[#allocation2 + $0x50] sm:$0xff] %vm231_vm0, %v2880_v27  ;;  %v2894_v31 = vld [vmem:[%s2764_s19 + $0x90] sm:$0xff] }
  0x1f   : > { %342 = vrot.lane.b32.xlu1 %v2791_v6, %s2712_s20  ;;  %340 = vrot.lane.b32.xlu0 %v2794_v7, %s2712_s20  ;;  %245 = vst.msk [vmem:[#allocation2 + $0x68] sm:$0xff] %vm231_vm0, %v2883_v28  ;;  %v2897_v32 = vld [vmem:[%s2764_s19 + $0xb0] sm:$0xff]  ;;  %v2900_v33 = vld [vmem:[%s2764_s19 + $0xa8] sm:$0xff]  ;;  %244 = vst.msk [vmem:[#allocation2 + $0x60] sm:$0xff] %vm231_vm0, %v2894_v31 }
  0x20   : > { %247 = vst.msk [vmem:[#allocation2 + $0x78] sm:$0xff] %vm231_vm0, %v2897_v32  ;;  %246 = vst.msk [vmem:[#allocation2 + $0x70] sm:$0xff] %vm231_vm0, %v2900_v33  ;;  %v2911_v34 = vld [vmem:[%s2764_s19 + $0xc8] sm:$0xff]  ;;  %v2914_v35 = vld [vmem:[%s2764_s19 + $0xc0] sm:$0xff] }
  0x21   : > { %249 = vst.msk [vmem:[#allocation2 + $0x88] sm:$0xff] %vm231_vm0, %v2911_v34  ;;  %248 = vst.msk [vmem:[#allocation2 + $0x80] sm:$0xff] %vm231_vm0, %v2914_v35  ;;  %v2921_v36 = vld [vmem:[%s2764_s19 + $0xe0] sm:$0xff]  ;;  %v2924_v37 = vld [vmem:[%s2764_s19 + $0xd8] sm:$0xff] }
  0x22   : > { %v2927_v38 = vld [vmem:[%s2764_s19 + $0xf8] sm:$0xff]  ;;  %251 = vst.msk [vmem:[#allocation2 + $0x98] sm:$0xff] %vm231_vm0, %v2921_v36  ;;  %250 = vst.msk [vmem:[#allocation2 + $0x90] sm:$0xff] %vm231_vm0, %v2924_v37  ;;  %v2936_v39 = vld [vmem:[%s2764_s19 + $0xf0] sm:$0xff] }
  0x23   : > { %346 = vrot.lane.b32.xlu1 %v2801_v8, %s2712_s20  ;;  %344 = vrot.lane.b32.xlu0 %v2804_v9, %s2712_s20  ;;  %253 = vst.msk [vmem:[#allocation2 + $0xa8] sm:$0xff] %vm231_vm0, %v2927_v38  ;;  %v2939_v40 = vld [vmem:[%s2764_s19 + $0x110] sm:$0xff]  ;;  %v2942_v41 = vld [vmem:[%s2764_s19 + $0x108] sm:$0xff]  ;;  %252 = vst.msk [vmem:[#allocation2 + $0xa0] sm:$0xff] %vm231_vm0, %v2936_v39 }
  0x24   : > { %255 = vst.msk [vmem:[#allocation2 + $0xb8] sm:$0xff] %vm231_vm0, %v2939_v40  ;;  %254 = vst.msk [vmem:[#allocation2 + $0xb0] sm:$0xff] %vm231_vm0, %v2942_v41  ;;  %v2953_v42 = vld [vmem:[%s2764_s19 + $0xe1] sm:$0xff]  ;;  %v2956_v43 = vld [vmem:[%s2764_s19 + $0xd9] sm:$0xff] }
  0x25   : > { %v2959_v44 = vld [vmem:[%s2764_s19 + $0x128] sm:$0xff]  ;;  %v2962_v45 = vld [vmem:[%s2764_s19 + $0x120] sm:$0xff]  ;;  %v2976_v47 = vld [vmem:[%s2764_s19 + $0xf1] sm:$0xff] }
  0x26   : > { %257 = vst.msk [vmem:[#allocation2 + $0xc8] sm:$0xff] %vm231_vm0, %v2959_v44  ;;  %256 = vst.msk [vmem:[#allocation2 + $0xc0] sm:$0xff] %vm231_vm0, %v2962_v45  ;;  %v2973_v46 = vld [vmem:[%s2764_s19 + $0xf9] sm:$0xff]  ;;  %v2993_v50 = vld [vmem:[%s2764_s19 + $0x111] sm:$0xff] }
  0x27   : > { %350 = vrot.lane.b32.xlu1 %v2811_v10, %s2712_s20  ;;  %348 = vrot.lane.b32.xlu0 %v2814_v11, %s2712_s20  ;;  %v2979_v48 = vld [vmem:[%s2764_s19 + $0x140] sm:$0xff]  ;;  %v2982_v49 = vld [vmem:[%s2764_s19 + $0x138] sm:$0xff]  ;;  %3902 = vst [vmem:[#allocation3_spill] sm:$0xff] %v2993_v50 }
  0x28   : > { %259 = vst.msk [vmem:[#allocation2 + $0xd8] sm:$0xff] %vm231_vm0, %v2979_v48  ;;  %258 = vst.msk [vmem:[#allocation2 + $0xd0] sm:$0xff] %vm231_vm0, %v2982_v49  ;;  %v2996_v51 = vld [vmem:[%s2764_s19 + $0x109] sm:$0xff]  ;;  %v2999_v52 = vld [vmem:[%s2764_s19 + $0x158] sm:$0xff] }
  0x29   : > { %3903 = vst [vmem:[#allocation4_spill] sm:$0xff] %v2996_v51  ;;  %v3002_v53 = vld [vmem:[%s2764_s19 + $0x150] sm:$0xff]  ;;  %261 = vst.msk [vmem:[#allocation2 + $0xe8] sm:$0xff] %vm231_vm0, %v2999_v52  ;;  %v288_v55 = vld [vmem:[%s2764_s19 + $0x121] sm:$0xff] }
  0x2a   : > { %260 = vst.msk [vmem:[#allocation2 + $0xe0] sm:$0xff] %vm231_vm0, %v3002_v53  ;;  %v289_v54 = vld [vmem:[%s2764_s19 + $0x129] sm:$0xff]  ;;  %v291_v58 = vld [vmem:[%s2764_s19 + $0x141] sm:$0xff]  ;;  %v290_v59 = vld [vmem:[%s2764_s19 + $0x139] sm:$0xff] }
  0x2b   : > { %354 = vrot.lane.b32.xlu1 %v2825_v14, %s2712_s20  ;;  %352 = vrot.lane.b32.xlu0 %v2828_v15, %s2712_s20  ;;  %v3015_v56 = vld [vmem:[%s2764_s19 + $0x170] sm:$0xff]  ;;  %v3018_v57 = vld [vmem:[%s2764_s19 + $0x168] sm:$0xff] }
  0x2c   : > { %263 = vst.msk [vmem:[#allocation2 + $0xf8] sm:$0xff] %vm231_vm0, %v3015_v56  ;;  %262 = vst.msk [vmem:[#allocation2 + $0xf0] sm:$0xff] %vm231_vm0, %v3018_v57  ;;  %v293_v60 = vld [vmem:[%s2764_s19 + $0x159] sm:$0xff]  ;;  %v292_v61 = vld [vmem:[%s2764_s19 + $0x151] sm:$0xff] }
  0x2d   : > { %v295_v62 = vld [vmem:[%s2764_s19 + $0x171] sm:$0xff]  ;;  %v294_v63 = vld [vmem:[%s2764_s19 + $0x169] sm:$0xff]  ;;  %v3046_v17 = vld [vmem:[%s2764_s19 + $0x1a] sm:$0xff] }
  0x2e   : > { %v458_v1 = vld [vmem:[%s2764_s19 + $0xa] sm:$0xff]  ;;  %v457_v3 = vld [vmem:[%s2764_s19 + $0x2] sm:$0xff] }
  0x2f   : > { %358 = vrot.lane.b32.xlu1 %v279_v18, %s2712_s20  ;;  %356 = vrot.lane.b32.xlu0 %v278_v21, %s2712_s20  ;;  %v3043_v13 = vld [vmem:[%s2764_s19 + $0x22] sm:$0xff]  ;;  %v3053_v18 = vld [vmem:[%s2764_s19 + $0x3a] sm:$0xff] }
  0x30   : > { %v3056_v21 = vld [vmem:[%s2764_s19 + $0x32] sm:$0xff] }
  0x33   : > { %362 = vrot.lane.b32.xlu1 %v281_v29, %s2712_s20  ;;  %360 = vrot.lane.b32.xlu0 %v280_v30, %s2712_s20  ;;  %v3063_v29 = vld [vmem:[%s2764_s19 + $0x52] sm:$0xff]  ;;  %v3066_v30 = vld [vmem:[%s2764_s19 + $0x4a] sm:$0xff] }
  0x34   : > { %3904 = vst [vmem:[#allocation5_spill] sm:$0xff] %v3063_v29  ;;  %3905 = vst [vmem:[#allocation6_spill] sm:$0xff] %v3066_v30 }
  0x37   : > { %366 = vrot.lane.b32.xlu1 %v2953_v42, %s2712_s20  ;;  %364 = vrot.lane.b32.xlu0 %v2956_v43, %s2712_s20 }
  0x3b   : > { %370 = vrot.lane.b32.xlu1 %v2973_v46, %s2712_s20  ;;  %368 = vrot.lane.b32.xlu0 %v2976_v47, %s2712_s20 }
  0x3f   : > { %374 = vrot.lane.b32.xlu1 %v2993_v50, %s2712_s20  ;;  %372 = vrot.lane.b32.xlu0 %v2996_v51, %s2712_s20 }
  0x43   : > { %378 = vrot.lane.b32.xlu1 %v289_v54, %s2712_s20  ;;  %376 = vrot.lane.b32.xlu0 %v288_v55, %s2712_s20  ;;  %v466_v54 = vld [vmem:[%s2764_s19 + $0x6a] sm:$0xff]  ;;  %v465_v55 = vld [vmem:[%s2764_s19 + $0x62] sm:$0xff] }
  0x47   : > { %382 = vrot.lane.b32.xlu1 %v291_v58, %s2712_s20  ;;  %380 = vrot.lane.b32.xlu0 %v290_v59, %s2712_s20  ;;  %v468_v58 = vld [vmem:[%s2764_s19 + $0x82] sm:$0xff]  ;;  %v467_v59 = vld [vmem:[%s2764_s19 + $0x7a] sm:$0xff] }
  0x4b   : > { %386 = vrot.lane.b32.xlu1 %v293_v60, %s2712_s20  ;;  %384 = vrot.lane.b32.xlu0 %v292_v61, %s2712_s20  ;;  %v470_v60 = vld [vmem:[%s2764_s19 + $0x9a] sm:$0xff]  ;;  %v469_v61 = vld [vmem:[%s2764_s19 + $0x92] sm:$0xff] }
  0x4f   : > { %390 = vrot.lane.b32.xlu1 %v295_v62, %s2712_s20  ;;  %388 = vrot.lane.b32.xlu0 %v294_v63, %s2712_s20  ;;  %v472_v62 = vld [vmem:[%s2764_s19 + $0xb2] sm:$0xff]  ;;  %v471_v63 = vld [vmem:[%s2764_s19 + $0xaa] sm:$0xff]  ;;  %s3774_s20 = scalar_lea.vmem %s3886_s3, %s2549_s11 }
  0x53   : > { %523 = vrot.lane.b32.xlu1 %v458_v1, %s2713_s21  ;;  %521 = vrot.lane.b32.xlu0 %v457_v3, %s2713_s21  ;;  %v474_v1 = vld [vmem:[%s2764_s19 + $0xca] sm:$0xff]  ;;  %v473_v3 = vld [vmem:[%s2764_s19 + $0xc2] sm:$0xff] }
  0x57   : > { %527 = vrot.lane.b32.xlu1 %v3043_v13, %s2713_s21  ;;  %525 = vrot.lane.b32.xlu0 %v3046_v17, %s2713_s21 }
  0x5b   : > { %531 = vrot.lane.b32.xlu1 %v3053_v18, %s2713_s21  ;;  %529 = vrot.lane.b32.xlu0 %v3056_v21, %s2713_s21 }
  0x5f   : > { %535 = vrot.lane.b32.xlu1 %v3063_v29, %s2713_s21  ;;  %533 = vrot.lane.b32.xlu0 %v3066_v30, %s2713_s21 }
  0x63   : > { %539 = vrot.lane.b32.xlu1 %v466_v54, %s2713_s21  ;;  %537 = vrot.lane.b32.xlu0 %v465_v55, %s2713_s21  ;;  %v3093_v54 = vld [vmem:[%s2764_s19 + $0xe2] sm:$0xff]  ;;  %v3096_v55 = vld [vmem:[%s2764_s19 + $0xda] sm:$0xff] }
  0x67   : > { %543 = vrot.lane.b32.xlu1 %v468_v58, %s2713_s21  ;;  %541 = vrot.lane.b32.xlu0 %v467_v59, %s2713_s21  ;;  %v3103_v58 = vld [vmem:[%s2764_s19 + $0xfa] sm:$0xff]  ;;  %v3106_v59 = vld [vmem:[%s2764_s19 + $0xf2] sm:$0xff] }
  0x6b   : > { %547 = vrot.lane.b32.xlu1 %v470_v60, %s2713_s21  ;;  %545 = vrot.lane.b32.xlu0 %v469_v61, %s2713_s21  ;;  %v3113_v60 = vld [vmem:[%s2764_s19 + $0x112] sm:$0xff]  ;;  %v3116_v61 = vld [vmem:[%s2764_s19 + $0x10a] sm:$0xff] }
  0x6c   : > { %3906 = vst [vmem:[#allocation7_spill] sm:$0xff] %v3113_v60  ;;  %3907 = vst [vmem:[#allocation8_spill] sm:$0xff] %v3116_v61 }
  0x6f   : > { %551 = vrot.lane.b32.xlu1 %v472_v62, %s2713_s21  ;;  %549 = vrot.lane.b32.xlu0 %v471_v63, %s2713_s21  ;;  %v3123_v62 = vld [vmem:[%s2764_s19 + $0x12a] sm:$0xff]  ;;  %v3126_v63 = vld [vmem:[%s2764_s19 + $0x122] sm:$0xff] }
  0x70   : > { %3908 = vst [vmem:[#allocation9_spill] sm:$0xff] %v3123_v62  ;;  %3909 = vst [vmem:[#allocation10_spill] sm:$0xff] %v3126_v63 }
  0x73   : > { %555 = vrot.lane.b32.xlu1 %v474_v1, %s2713_s21  ;;  %553 = vrot.lane.b32.xlu0 %v473_v3, %s2713_s21  ;;  %v484_v1 = vld [vmem:[%s2764_s19 + $0x142] sm:$0xff]  ;;  %v483_v3 = vld [vmem:[%s2764_s19 + $0x13a] sm:$0xff] }
  0x77   : > { %559 = vrot.lane.b32.xlu1 %v3093_v54, %s2713_s21  ;;  %557 = vrot.lane.b32.xlu0 %v3096_v55, %s2713_s21 }
  0x7b   : > { %563 = vrot.lane.b32.xlu1 %v3103_v58, %s2713_s21  ;;  %561 = vrot.lane.b32.xlu0 %v3106_v59, %s2713_s21 }
  0x7f   : > { %567 = vrot.lane.b32.xlu1 %v3113_v60, %s2713_s21  ;;  %565 = vrot.lane.b32.xlu0 %v3116_v61, %s2713_s21  ;;  %v486_v61 = vld [vmem:[%s2764_s19 + $0x15a] sm:$0xff] }
  0x83   : > { %571 = vrot.lane.b32.xlu1 %v3123_v62, %s2713_s21  ;;  %569 = vrot.lane.b32.xlu0 %v3126_v63, %s2713_s21  ;;  %v485_v62 = vld [vmem:[%s2764_s19 + $0x152] sm:$0xff] }
  0x84   : > { %v488_v63 = vld [vmem:[%s2764_s19 + $0x172] sm:$0xff] }
  0x85   : > { %v333_v29 = vpop.permute.xlu1 %332  ;;  %v329_v60 = vpop.permute.xlu0 %328 }
  0x86   : > { %427 = vst.msk [vmem:[#allocation2 + $0x10] sm:$0xff] %vm424_vm1, %v333_v29  ;;  %425 = vst.msk [vmem:[#allocation2] sm:$0xff] %vm424_vm1, %v329_v60  ;;  %v487_v29 = vld [vmem:[%s2764_s19 + $0x16a] sm:$0xff] }
  0x87   : > { %575 = vrot.lane.b32.xlu1 %v484_v1, %s2713_s21  ;;  %573 = vrot.lane.b32.xlu0 %v483_v3, %s2713_s21 }
  0x89   : > { %v335_v50 = vpop.permute.xlu1 %334  ;;  %v331_v30 = vpop.permute.xlu0 %330 }
  0x8a   : > { %428 = vst.msk [vmem:[#allocation2 + $0x18] sm:$0xff] %vm424_vm1, %v335_v50  ;;  %426 = vst.msk [vmem:[#allocation2 + $0x8] sm:$0xff] %vm424_vm1, %v331_v30 }
  0x8b   : > { %579 = vrot.lane.b32.xlu1 %v486_v61, %s2713_s21  ;;  %577 = vrot.lane.b32.xlu0 %v485_v62, %s2713_s21 }
  0x8d   : > { %v339_v51 = vpop.permute.xlu1 %338  ;;  %v337_v60 = vpop.permute.xlu0 %336 }
  0x8e   : > { %430 = vst.msk [vmem:[#allocation2 + $0x28] sm:$0xff] %vm424_vm1, %v339_v51  ;;  %429 = vst.msk [vmem:[#allocation2 + $0x20] sm:$0xff] %vm424_vm1, %v337_v60 }
  0x8f   : > { %583 = vrot.lane.b32.xlu1 %v488_v63, %s2713_s21  ;;  %581 = vrot.lane.b32.xlu0 %v487_v29, %s2713_s21 }
  0x91   : > { %v343_v1 = vpop.permute.xlu1 %342  ;;  %v341_v50 = vpop.permute.xlu0 %340 }
  0x92   : > { %432 = vst.msk [vmem:[#allocation2 + $0x38] sm:$0xff] %vm424_vm1, %v343_v1  ;;  %431 = vst.msk [vmem:[#allocation2 + $0x30] sm:$0xff] %vm424_vm1, %v341_v50 }
  0x93   : > { %719 = vrot.lane.b32.xlu1 %v2834_v16, %s2714_s22  ;;  %717 = vrot.lane.b32.xlu0 %v2821_v12, %s2714_s22 }
  0x95   : > { %v347_v51 = vpop.permute.xlu1 %346  ;;  %v345_v30 = vpop.permute.xlu0 %344 }
  0x96   : > { %434 = vst.msk [vmem:[#allocation2 + $0x48] sm:$0xff] %vm424_vm1, %v347_v51  ;;  %433 = vst.msk [vmem:[#allocation2 + $0x40] sm:$0xff] %vm424_vm1, %v345_v30 }
  0x97   : > { %723 = vrot.lane.b32.xlu1 %v2842_v19, %s2714_s22  ;;  %721 = vrot.lane.b32.xlu0 %v2845_v20, %s2714_s22 }
  0x99   : > { %v351_v61 = vpop.permute.xlu1 %350  ;;  %v349_v62 = vpop.permute.xlu0 %348 }
  0x9a   : > { %436 = vst.msk [vmem:[#allocation2 + $0x58] sm:$0xff] %vm424_vm1, %v351_v61  ;;  %435 = vst.msk [vmem:[#allocation2 + $0x50] sm:$0xff] %vm424_vm1, %v349_v62 }
  0x9b   : > { %727 = vrot.lane.b32.xlu1 %v2857_v22, %s2714_s22  ;;  %725 = vrot.lane.b32.xlu0 %v2862_v23, %s2714_s22 }
  0x9d   : > { %v355_v12 = vpop.permute.xlu1 %354  ;;  %v353_v16 = vpop.permute.xlu0 %352 }
  0x9e   : > { %438 = vst.msk [vmem:[#allocation2 + $0x68] sm:$0xff] %vm424_vm1, %v355_v12  ;;  %437 = vst.msk [vmem:[#allocation2 + $0x60] sm:$0xff] %vm424_vm1, %v353_v16 }
  0x9f   : > { %731 = vrot.lane.b32.xlu1 %v2865_v24, %s2714_s22  ;;  %729 = vrot.lane.b32.xlu0 %v2868_v25, %s2714_s22 }
  0xa1   : > { %v359_v63 = vpop.permute.xlu1 %358  ;;  %v357_v3 = vpop.permute.xlu0 %356 }
  0xa2   : > { %440 = vst.msk [vmem:[#allocation2 + $0x78] sm:$0xff] %vm424_vm1, %v359_v63  ;;  %439 = vst.msk [vmem:[#allocation2 + $0x70] sm:$0xff] %vm424_vm1, %v357_v3 }
  0xa3   : > { %735 = vrot.lane.b32.xlu1 %v2877_v26, %s2714_s22  ;;  %733 = vrot.lane.b32.xlu0 %v2880_v27, %s2714_s22 }
  0xa5   : > { %v363_v29 = vpop.permute.xlu1 %362  ;;  %v361_v60 = vpop.permute.xlu0 %360 }
  0xa6   : > { %442 = vst.msk [vmem:[#allocation2 + $0x88] sm:$0xff] %vm424_vm1, %v363_v29  ;;  %441 = vst.msk [vmem:[#allocation2 + $0x80] sm:$0xff] %vm424_vm1, %v361_v60  ;;  %v2352_v29 = vld [vmem:[%s2764_s19 + $0x188] sm:$0xff]  ;;  %v2351_v60 = vld [vmem:[%s2764_s19 + $0x180] sm:$0xff] }
  0xa7   : > { %739 = vrot.lane.b32.xlu1 %v2883_v28, %s2714_s22  ;;  %737 = vrot.lane.b32.xlu0 %v2894_v31, %s2714_s22 }
  0xa9   : > { %v367_v1 = vpop.permute.xlu1 %366  ;;  %v365_v50 = vpop.permute.xlu0 %364 }
  0xaa   : > { %444 = vst.msk [vmem:[#allocation2 + $0x98] sm:$0xff] %vm424_vm1, %v367_v1  ;;  %443 = vst.msk [vmem:[#allocation2 + $0x90] sm:$0xff] %vm424_vm1, %v365_v50 }
  0xab   : > { %743 = vrot.lane.b32.xlu1 %v2897_v32, %s2714_s22  ;;  %741 = vrot.lane.b32.xlu0 %v2900_v33, %s2714_s22 }
  0xad   : > { %v371_v51 = vpop.permute.xlu1 %370  ;;  %v369_v30 = vpop.permute.xlu0 %368 }
  0xae   : > { %446 = vst.msk [vmem:[#allocation2 + $0xa8] sm:$0xff] %vm424_vm1, %v371_v51  ;;  %445 = vst.msk [vmem:[#allocation2 + $0xa0] sm:$0xff] %vm424_vm1, %v369_v30 }
  0xaf   : > { %747 = vrot.lane.b32.xlu1 %v2911_v34, %s2714_s22  ;;  %745 = vrot.lane.b32.xlu0 %v2914_v35, %s2714_s22 }
  0xb1   : > { %v375_v28 = vpop.permute.xlu1 %374  ;;  %v373_v31 = vpop.permute.xlu0 %372 }
  0xb2   : > { %448 = vst.msk [vmem:[#allocation2 + $0xb8] sm:$0xff] %vm424_vm1, %v375_v28  ;;  %447 = vst.msk [vmem:[#allocation2 + $0xb0] sm:$0xff] %vm424_vm1, %v373_v31 }
  0xb3   : > { %751 = vrot.lane.b32.xlu1 %v2921_v36, %s2714_s22  ;;  %749 = vrot.lane.b32.xlu0 %v2924_v37, %s2714_s22 }
  0xb5   : > { %v379_v32 = vpop.permute.xlu1 %378  ;;  %v377_v33 = vpop.permute.xlu0 %376 }
  0xb6   : > { %450 = vst.msk [vmem:[#allocation2 + $0xc8] sm:$0xff] %vm424_vm1, %v379_v32  ;;  %449 = vst.msk [vmem:[#allocation2 + $0xc0] sm:$0xff] %vm424_vm1, %v377_v33 }
  0xb7   : > { %755 = vrot.lane.b32.xlu1 %v2927_v38, %s2714_s22  ;;  %753 = vrot.lane.b32.xlu0 %v2936_v39, %s2714_s22 }
  0xb9   : > { %v383_v34 = vpop.permute.xlu1 %382  ;;  %v381_v35 = vpop.permute.xlu0 %380 }
  0xba   : > { %452 = vst.msk [vmem:[#allocation2 + $0xd8] sm:$0xff] %vm424_vm1, %v383_v34  ;;  %451 = vst.msk [vmem:[#allocation2 + $0xd0] sm:$0xff] %vm424_vm1, %v381_v35 }
  0xbb   : > { %759 = vrot.lane.b32.xlu1 %v2939_v40, %s2714_s22  ;;  %757 = vrot.lane.b32.xlu0 %v2942_v41, %s2714_s22 }
  0xbd   : > { %v387_v36 = vpop.permute.xlu1 %386  ;;  %v385_v37 = vpop.permute.xlu0 %384 }
  0xbe   : > { %454 = vst.msk [vmem:[#allocation2 + $0xe8] sm:$0xff] %vm424_vm1, %v387_v36  ;;  %453 = vst.msk [vmem:[#allocation2 + $0xe0] sm:$0xff] %vm424_vm1, %v385_v37  ;;  %v1849_v36 = vld [vmem:[%s3884_s1 + $0x18] sm:$0xff] }
  0xbf   : > { %763 = vrot.lane.b32.xlu1 %v2959_v44, %s2714_s22  ;;  %761 = vrot.lane.b32.xlu0 %v2962_v45, %s2714_s22 }
  0xc1   : > { %v391_v61 = vpop.permute.xlu1 %390  ;;  %v389_v62 = vpop.permute.xlu0 %388 }
  0xc2   : > { %456 = vst.msk [vmem:[#allocation2 + $0xf8] sm:$0xff] %vm424_vm1, %v391_v61  ;;  %455 = vst.msk [vmem:[#allocation2 + $0xf0] sm:$0xff] %vm424_vm1, %v389_v62  ;;  %v1847_v61 = vld [vmem:[%s3884_s1 + $0x8] sm:$0xff]  ;;  %v1846_v62 = vld [vmem:[%s3884_s1] sm:$0xff] }
  0xc3   : > { %767 = vrot.lane.b32.xlu1 %v2979_v48, %s2714_s22  ;;  %765 = vrot.lane.b32.xlu0 %v2982_v49, %s2714_s22 }
  0xc5   : > { %v524_v12 = vpop.permute.xlu1 %523  ;;  %v522_v16 = vpop.permute.xlu0 %521 }
  0xc6   : > { %619 = vst.msk [vmem:[#allocation2 + $0x8] sm:$0xff] %vm617_vm2, %v524_v12  ;;  %618 = vst.msk [vmem:[#allocation2] sm:$0xff] %vm617_vm2, %v522_v16 }
  0xc7   : > { %771 = vrot.lane.b32.xlu1 %v2999_v52, %s2714_s22  ;;  %769 = vrot.lane.b32.xlu0 %v3002_v53, %s2714_s22 }
  0xc9   : > { %v528_v63 = vpop.permute.xlu1 %527  ;;  %v526_v3 = vpop.permute.xlu0 %525 }
  0xca   : > { %621 = vst.msk [vmem:[#allocation2 + $0x18] sm:$0xff] %vm617_vm2, %v528_v63  ;;  %620 = vst.msk [vmem:[#allocation2 + $0x10] sm:$0xff] %vm617_vm2, %v526_v3 }
  0xcb   : > { %775 = vrot.lane.b32.xlu1 %v3015_v56, %s2714_s22  ;;  %773 = vrot.lane.b32.xlu0 %v3018_v57, %s2714_s22 }
  0xcd   : > { %v532_v1 = vpop.permute.xlu1 %531  ;;  %v530_v50 = vpop.permute.xlu0 %529 }
  0xce   : > { %623 = vst.msk [vmem:[#allocation2 + $0x28] sm:$0xff] %vm617_vm2, %v532_v1  ;;  %622 = vst.msk [vmem:[#allocation2 + $0x20] sm:$0xff] %vm617_vm2, %v530_v50 }
  0xcf   : > { %779 = vrot.lane.b32.xlu1 %v2352_v29, %s2714_s22  ;;  %777 = vrot.lane.b32.xlu0 %v2351_v60, %s2714_s22 }
  0xd1   : > { %v536_v51 = vpop.permute.xlu1 %535  ;;  %v534_v30 = vpop.permute.xlu0 %533 }
  0xd2   : > { %625 = vst.msk [vmem:[#allocation2 + $0x38] sm:$0xff] %vm617_vm2, %v536_v51  ;;  %624 = vst.msk [vmem:[#allocation2 + $0x30] sm:$0xff] %vm617_vm2, %v534_v30  ;;  %v3912_v51 = vld [vmem:[#allocation3_spill] sm:$0xff] }
  0xd3   : > { %912 = vrot.lane.b32.xlu1 %v2774_v2, %s2715_s23  ;;  %910 = vrot.lane.b32.xlu0 %v2767_v0, %s2715_s23 }
  0xd5   : > { %v540_v56 = vpop.permute.xlu1 %539  ;;  %v538_v57 = vpop.permute.xlu0 %537 }
  0xd6   : > { %627 = vst.msk [vmem:[#allocation2 + $0x48] sm:$0xff] %vm617_vm2, %v540_v56  ;;  %626 = vst.msk [vmem:[#allocation2 + $0x40] sm:$0xff] %vm617_vm2, %v538_v57 }
  0xd7   : > { %916 = vrot.lane.b32.xlu1 %v2781_v4, %s2715_s23  ;;  %914 = vrot.lane.b32.xlu0 %v2784_v5, %s2715_s23 }
  0xd9   : > { %v544_v28 = vpop.permute.xlu1 %543  ;;  %v542_v31 = vpop.permute.xlu0 %541 }
  0xda   : > { %629 = vst.msk [vmem:[#allocation2 + $0x58] sm:$0xff] %vm617_vm2, %v544_v28  ;;  %628 = vst.msk [vmem:[#allocation2 + $0x50] sm:$0xff] %vm617_vm2, %v542_v31 }
  0xdb   : > { %920 = vrot.lane.b32.xlu1 %v2791_v6, %s2715_s23  ;;  %918 = vrot.lane.b32.xlu0 %v2794_v7, %s2715_s23 }
  0xdd   : > { %v548_v0 = vpop.permute.xlu1 %547  ;;  %v546_v2 = vpop.permute.xlu0 %545 }
  0xde   : > { %631 = vst.msk [vmem:[#allocation2 + $0x68] sm:$0xff] %vm617_vm2, %v548_v0  ;;  %630 = vst.msk [vmem:[#allocation2 + $0x60] sm:$0xff] %vm617_vm2, %v546_v2  ;;  %v3914_v2 = vld [vmem:[#allocation7_spill] sm:$0xff] }
  0xdf   : > { %924 = vrot.lane.b32.xlu1 %v2801_v8, %s2715_s23  ;;  %922 = vrot.lane.b32.xlu0 %v2804_v9, %s2715_s23 }
  0xe1   : > { %v552_v32 = vpop.permute.xlu1 %551  ;;  %v550_v33 = vpop.permute.xlu0 %549 }
  0xe2   : > { %633 = vst.msk [vmem:[#allocation2 + $0x78] sm:$0xff] %vm617_vm2, %v552_v32  ;;  %632 = vst.msk [vmem:[#allocation2 + $0x70] sm:$0xff] %vm617_vm2, %v550_v33  ;;  %v3915_v32 = vld [vmem:[#allocation5_spill] sm:$0xff] }
  0xe3   : > { %928 = vrot.lane.b32.xlu1 %v2811_v10, %s2715_s23  ;;  %926 = vrot.lane.b32.xlu0 %v2814_v11, %s2715_s23 }
  0xe5   : > { %v556_v34 = vpop.permute.xlu1 %555  ;;  %v554_v35 = vpop.permute.xlu0 %553 }
  0xe6   : > { %635 = vst.msk [vmem:[#allocation2 + $0x88] sm:$0xff] %vm617_vm2, %v556_v34  ;;  %634 = vst.msk [vmem:[#allocation2 + $0x80] sm:$0xff] %vm617_vm2, %v554_v35 }
  0xe7   : > { %932 = vrot.lane.b32.xlu1 %v2825_v14, %s2715_s23  ;;  %930 = vrot.lane.b32.xlu0 %v2828_v15, %s2715_s23 }
  0xe9   : > { %v560_v8 = vpop.permute.xlu1 %559  ;;  %v558_v9 = vpop.permute.xlu0 %557 }
  0xea   : > { %637 = vst.msk [vmem:[#allocation2 + $0x98] sm:$0xff] %vm617_vm2, %v560_v8  ;;  %636 = vst.msk [vmem:[#allocation2 + $0x90] sm:$0xff] %vm617_vm2, %v558_v9 }
  0xeb   : > { %944 = vrot.lane.b32.xlu1 %v2953_v42, %s2715_s23  ;;  %942 = vrot.lane.b32.xlu0 %v2956_v43, %s2715_s23 }
  0xed   : > { %v564_v10 = vpop.permute.xlu1 %563  ;;  %v562_v11 = vpop.permute.xlu0 %561 }
  0xee   : > { %639 = vst.msk [vmem:[#allocation2 + $0xa8] sm:$0xff] %vm617_vm2, %v564_v10  ;;  %638 = vst.msk [vmem:[#allocation2 + $0xa0] sm:$0xff] %vm617_vm2, %v562_v11  ;;  %v2469_v11 = vld [vmem:[%s2764_s19 + $0x121] sm:$0xff] }
  0xef   : > { %1135 = vrot.lane.b32.xlu1 %v3096_v55, %s2716_s24  ;;  %1103 = vrot.lane.b32.xlu0 %v3046_v17, %s2716_s24 }
  0xf1   : > { %v568_v14 = vpop.permute.xlu1 %567  ;;  %v566_v15 = vpop.permute.xlu0 %565 }
  0xf2   : > { %641 = vst.msk [vmem:[#allocation2 + $0xb8] sm:$0xff] %vm617_vm2, %v568_v14  ;;  %640 = vst.msk [vmem:[#allocation2 + $0xb0] sm:$0xff] %vm617_vm2, %v566_v15  ;;  %v2454_v15 = vld [vmem:[%s2764_s19 + $0x69] sm:$0xff] }
  0xf3   : > { %1137 = vrot.lane.b32.xlu1 %v3093_v54, %s2716_s24  ;;  %1105 = vrot.lane.b32.xlu0 %v3043_v13, %s2716_s24 }
  0xf5   : > { %v572_v42 = vpop.permute.xlu1 %571  ;;  %v570_v43 = vpop.permute.xlu0 %569 }
  0xf6   : > { %643 = vst.msk [vmem:[#allocation2 + $0xc8] sm:$0xff] %vm617_vm2, %v572_v42  ;;  %642 = vst.msk [vmem:[#allocation2 + $0xc0] sm:$0xff] %vm617_vm2, %v570_v43  ;;  %v2470_v43 = vld [vmem:[%s2764_s19 + $0x129] sm:$0xff] }
  0xf7   : > { %1331 = vrot.lane.b32.xlu1 %v2936_v39, %s2717_s25  ;;  %1299 = vrot.lane.b32.xlu0 %v2845_v20, %s2717_s25 }
  0xf9   : > { %v576_v17 = vpop.permute.xlu1 %575  ;;  %v574_v55 = vpop.permute.xlu0 %573 }
  0xfa   : > { %645 = vst.msk [vmem:[#allocation2 + $0xd8] sm:$0xff] %vm617_vm2, %v576_v17  ;;  %644 = vst.msk [vmem:[#allocation2 + $0xd0] sm:$0xff] %vm617_vm2, %v574_v55 }
  0xfb   : > { %1333 = vrot.lane.b32.xlu1 %v2927_v38, %s2717_s25  ;;  %1301 = vrot.lane.b32.xlu0 %v2842_v19, %s2717_s25  ;;  %v1850_v19 = vld [vmem:[%s3884_s1 + $0x20] sm:$0xf] }
  0xfc   : > { %2587 = vmatprep.subr.msk.mxu0 %vm1955_vm4, %v1850_v19  ;;  %2645 = vmatprep.subr.msk.mxu1 %vm1955_vm4, %v1850_v19 }
  0xfd   : > { %v580_v13 = vpop.permute.xlu1 %579  ;;  %v578_v54 = vpop.permute.xlu0 %577  ;;  %2588 = vmatpush3.msk.msra.mxu0 %vm1955_vm4, %v1850_v19  ;;  %2650 = vmatpush3.msk.msra.mxu1 %vm1955_vm4, %v1850_v19 }
  0xfe   : > { %647 = vst.msk [vmem:[#allocation2 + $0xe8] sm:$0xff] %vm617_vm2, %v580_v13  ;;  %646 = vst.msk [vmem:[#allocation2 + $0xe0] sm:$0xff] %vm617_vm2, %v578_v54  ;;  %2589 = vmatprep.subr.mxu0 %v1849_v36  ;;  %2646 = vmatprep.subr.mxu1 %v1849_v36 }
  0xff   : > { %1524 = vrot.lane.b32.xlu1 %v2976_v47, %s2718_s26  ;;  %1492 = vrot.lane.b32.xlu0 %v2784_v5, %s2718_s26 }
 0x100   : > { %2590 = vmatpush3.msra.mxu0 %v1849_v36  ;;  %2651 = vmatpush3.msra.mxu1 %v1849_v36 }
 0x101   : > { %v584_v20 = vpop.permute.xlu1 %583  ;;  %v582_v39 = vpop.permute.xlu0 %581 }
 0x102   : > { %649 = vst.msk [vmem:[#allocation2 + $0xf8] sm:$0xff] %vm617_vm2, %v584_v20  ;;  %648 = vst.msk [vmem:[#allocation2 + $0xf0] sm:$0xff] %vm617_vm2, %v582_v39  ;;  %v3916_v20 = vld [vmem:[#allocation10_spill] sm:$0xff] }
 0x103   : > { %1494 = vrot.lane.b32.xlu1 %v2781_v4, %s2718_s26  ;;  %946 = vrot.lane.b32.xlu0 %v2976_v47, %s2715_s23  ;;  %v1848_v4 = vld [vmem:[%s3884_s1 + $0x10] sm:$0xff] }
 0x104   : > { %2591 = vmatprep.subr.mxu0 %v1848_v4  ;;  %2647 = vmatprep.subr.mxu1 %v1848_v4 }
 0x105   : > { %v720_v5 = vpop.permute.xlu1 %719  ;;  %v718_v38 = vpop.permute.xlu0 %717  ;;  %2592 = vmatpush3.msra.mxu0 %v1848_v4  ;;  %2652 = vmatpush3.msra.mxu1 %v1848_v4  ;;  %v3917_v4 = vld [vmem:[#allocation9_spill] sm:$0xff] }
 0x106   : > { %815 = vst.msk [vmem:[#allocation2 + $0x8] sm:$0xff] %vm813_vm3, %v720_v5  ;;  %814 = vst.msk [vmem:[#allocation2] sm:$0xff] %vm813_vm3, %v718_v38  ;;  %2593 = vmatprep.subr.mxu0 %v1847_v61  ;;  %2648 = vmatprep.subr.mxu1 %v1847_v61  ;;  %v2486_v5 = vld [vmem:[%s2764_s19 + $0x6a] sm:$0xff] }
 0x107   : > { %1685 = vrot.lane.b32.xlu1 %v3056_v21, %s2719_s4  ;;  %1526 = vrot.lane.b32.xlu0 %v2973_v46, %s2718_s26 }
 0x108   : > { %2594 = vmatpush3.msra.mxu0 %v1847_v61  ;;  %2653 = vmatpush3.msra.mxu1 %v1847_v61 }
 0x109   : > { %v724_v47 = vpop.permute.xlu1 %723  ;;  %v722_v37 = vpop.permute.xlu0 %721  ;;  %2595 = vmatprep.subr.mxu0 %v1846_v62  ;;  %2649 = vmatprep.subr.mxu1 %v1846_v62 }
 0x10a   : > { %817 = vst.msk [vmem:[#allocation2 + $0x18] sm:$0xff] %vm813_vm3, %v724_v47  ;;  %816 = vst.msk [vmem:[#allocation2 + $0x10] sm:$0xff] %vm813_vm3, %v722_v37  ;;  %2596 = vmatpush3.msra.mxu0 %v1846_v62  ;;  %2654 = vmatpush3.msra.mxu1 %v1846_v62  ;;  %v2408_v47 = vld [vmem:[%s2764_s19 + $0x12a] sm:$0xff] }
 0x10b   : > { %948 = vrot.lane.b32.xlu1 %v2973_v46, %s2715_s23  ;;  %1717 = vrot.lane.b32.xlu0 %v3106_v59, %s2719_s4 }
 0x10d   : > { %v728_v12 = vpop.permute.xlu1 %727  ;;  %v726_v16 = vpop.permute.xlu0 %725 }
 0x10e   : > { %819 = vst.msk [vmem:[#allocation2 + $0x28] sm:$0xff] %vm813_vm3, %v728_v12  ;;  %818 = vst.msk [vmem:[#allocation2 + $0x20] sm:$0xff] %vm813_vm3, %v726_v16 }
 0x10f   : > { %1139 = vrot.lane.b32.xlu1 %v3106_v59, %s2716_s24  ;;  %1107 = vrot.lane.b32.xlu0 %v3056_v21, %s2716_s24 }
 0x111   : > { %v732_v46 = vpop.permute.xlu1 %731  ;;  %v730_v63 = vpop.permute.xlu0 %729 }
 0x112   : > { %821 = vst.msk [vmem:[#allocation2 + $0x38] sm:$0xff] %vm813_vm3, %v732_v46  ;;  %820 = vst.msk [vmem:[#allocation2 + $0x30] sm:$0xff] %vm813_vm3, %v730_v63  ;;  %v2471_v63 = vld [vmem:[%s2764_s19 + $0x139] sm:$0xff] }
 0x113   : > { %1719 = vrot.lane.b32.xlu1 %v3103_v58, %s2719_s4  ;;  %1687 = vrot.lane.b32.xlu0 %v3053_v18, %s2719_s4 }
 0x115   : > { %v736_v3 = vpop.permute.xlu1 %735  ;;  %v734_v29 = vpop.permute.xlu0 %733 }
 0x116   : > { %823 = vst.msk [vmem:[#allocation2 + $0x48] sm:$0xff] %vm813_vm3, %v736_v3  ;;  %822 = vst.msk [vmem:[#allocation2 + $0x40] sm:$0xff] %vm813_vm3, %v734_v29  ;;  %v2456_v29 = vld [vmem:[%s2764_s19 + $0x81] sm:$0xff] }
 0x117   : > { %1141 = vrot.lane.b32.xlu1 %v3103_v58, %s2716_s24  ;;  %1109 = vrot.lane.b32.xlu0 %v3053_v18, %s2716_s24 }
 0x119   : > { %v740_v21 = vpop.permute.xlu1 %739  ;;  %v738_v59 = vpop.permute.xlu0 %737 }
 0x11a   : > { %825 = vst.msk [vmem:[#allocation2 + $0x58] sm:$0xff] %vm813_vm3, %v740_v21  ;;  %824 = vst.msk [vmem:[#allocation2 + $0x50] sm:$0xff] %vm813_vm3, %v738_v59  ;;  %v2472_v59 = vld [vmem:[%s2764_s19 + $0x141] sm:$0xff] }
 0x11b   : > { %1335 = vrot.lane.b32.xlu1 %v2942_v41, %s2717_s25  ;;  %1303 = vrot.lane.b32.xlu0 %v2862_v23, %s2717_s25  ;;  %v3910_v23 = vld [vmem:[#allocation4_spill] sm:$0xff] }
 0x11d   : > { %v744_v60 = vpop.permute.xlu1 %743  ;;  %v742_v1 = vpop.permute.xlu0 %741 }
 0x11e   : > { %827 = vst.msk [vmem:[#allocation2 + $0x68] sm:$0xff] %vm813_vm3, %v744_v60  ;;  %826 = vst.msk [vmem:[#allocation2 + $0x60] sm:$0xff] %vm813_vm3, %v742_v1 }
 0x11f   : > { %1337 = vrot.lane.b32.xlu1 %v2939_v40, %s2717_s25  ;;  %1305 = vrot.lane.b32.xlu0 %v2857_v22, %s2717_s25 }
 0x121   : > { %v748_v18 = vpop.permute.xlu1 %747  ;;  %v746_v58 = vpop.permute.xlu0 %745 }
 0x122   : > { %829 = vst.msk [vmem:[#allocation2 + $0x78] sm:$0xff] %vm813_vm3, %v748_v18  ;;  %828 = vst.msk [vmem:[#allocation2 + $0x70] sm:$0xff] %vm813_vm3, %v746_v58  ;;  %v2503_v18 = vld [vmem:[%s2764_s19 + $0x13a] sm:$0xff] }
 0x123   : > { %1528 = vrot.lane.b32.xlu1 %v3910_v23, %s2718_s26  ;;  %1496 = vrot.lane.b32.xlu0 %v2794_v7, %s2718_s26  ;;  %v3911_v7 = vld [vmem:[#allocation6_spill] sm:$0xff] }
 0x125   : > { %v752_v41 = vpop.permute.xlu1 %751  ;;  %v750_v50 = vpop.permute.xlu0 %749 }
 0x126   : > { %831 = vst.msk [vmem:[#allocation2 + $0x88] sm:$0xff] %vm813_vm3, %v752_v41  ;;  %830 = vst.msk [vmem:[#allocation2 + $0x80] sm:$0xff] %vm813_vm3, %v750_v50 }
 0x127   : > { %1498 = vrot.lane.b32.xlu1 %v2791_v6, %s2718_s26  ;;  %950 = vrot.lane.b32.xlu0 %v3910_v23, %s2715_s23  ;;  %v3913_v6 = vld [vmem:[#allocation8_spill] sm:$0xff] }
 0x129   : > { %v756_v22 = vpop.permute.xlu1 %755  ;;  %v754_v40 = vpop.permute.xlu0 %753 }
 0x12a   : > { %833 = vst.msk [vmem:[#allocation2 + $0x98] sm:$0xff] %vm813_vm3, %v756_v22  ;;  %832 = vst.msk [vmem:[#allocation2 + $0x90] sm:$0xff] %vm813_vm3, %v754_v40  ;;  %v2504_v22 = vld [vmem:[%s2764_s19 + $0x142] sm:$0xff] }
 0x12b   : > { %1689 = vrot.lane.b32.xlu1 %v3911_v7, %s2719_s4  ;;  %1530 = vrot.lane.b32.xlu0 %v3912_v51, %s2718_s26  ;;  %v2488_v40 = vld [vmem:[%s2764_s19 + $0x82] sm:$0xff] }
 0x12d   : > { %v760_v30 = vpop.permute.xlu1 %759  ;;  %v758_v56 = vpop.permute.xlu0 %757 }
 0x12e   : > { %835 = vst.msk [vmem:[#allocation2 + $0xa8] sm:$0xff] %vm813_vm3, %v760_v30  ;;  %834 = vst.msk [vmem:[#allocation2 + $0xa0] sm:$0xff] %vm813_vm3, %v758_v56 }
 0x12f   : > { %952 = vrot.lane.b32.xlu1 %v3912_v51, %s2715_s23  ;;  %1721 = vrot.lane.b32.xlu0 %v3913_v6, %s2719_s4 }
 0x131   : > { %v764_v57 = vpop.permute.xlu1 %763  ;;  %v762_v28 = vpop.permute.xlu0 %761 }
 0x132   : > { %837 = vst.msk [vmem:[#allocation2 + $0xb8] sm:$0xff] %vm813_vm3, %v764_v57  ;;  %836 = vst.msk [vmem:[#allocation2 + $0xb0] sm:$0xff] %vm813_vm3, %v762_v28  ;;  %v2425_v57 = vld [vmem:[%s2764_s19 + $0x90] sm:$0xff] }
 0x133   : > { %1143 = vrot.lane.b32.xlu1 %v3913_v6, %s2716_s24  ;;  %1111 = vrot.lane.b32.xlu0 %v3911_v7, %s2716_s24 }
 0x135   : > { %v768_v31 = vpop.permute.xlu1 %767  ;;  %v766_v0 = vpop.permute.xlu0 %765 }
 0x136   : > { %839 = vst.msk [vmem:[#allocation2 + $0xc8] sm:$0xff] %vm813_vm3, %v768_v31  ;;  %838 = vst.msk [vmem:[#allocation2 + $0xc0] sm:$0xff] %vm813_vm3, %v766_v0 }
 0x137   : > { %1723 = vrot.lane.b32.xlu1 %v3914_v2, %s2719_s4  ;;  %1691 = vrot.lane.b32.xlu0 %v3915_v32, %s2719_s4 }
 0x139   : > { %v772_v33 = vpop.permute.xlu1 %771  ;;  %v770_v34 = vpop.permute.xlu0 %769 }
 0x13a   : > { %841 = vst.msk [vmem:[#allocation2 + $0xd8] sm:$0xff] %vm813_vm3, %v772_v33  ;;  %840 = vst.msk [vmem:[#allocation2 + $0xd0] sm:$0xff] %vm813_vm3, %v770_v34  ;;  %v2473_v34 = vld [vmem:[%s2764_s19 + $0x151] sm:$0xff] }
 0x13b   : > { %1145 = vrot.lane.b32.xlu1 %v3914_v2, %s2716_s24  ;;  %1113 = vrot.lane.b32.xlu0 %v3915_v32, %s2716_s24  ;;  %v2426_v2 = vld [vmem:[%s2764_s19 + $0x98] sm:$0xff] }
 0x13d   : > { %v776_v35 = vpop.permute.xlu1 %775  ;;  %v774_v8 = vpop.permute.xlu0 %773 }
 0x13e   : > { %843 = vst.msk [vmem:[#allocation2 + $0xe8] sm:$0xff] %vm813_vm3, %v776_v35  ;;  %842 = vst.msk [vmem:[#allocation2 + $0xe0] sm:$0xff] %vm813_vm3, %v774_v8  ;;  %v2457_v35 = vld [vmem:[%s2764_s19 + $0x91] sm:$0xff] }
 0x13f   : > { %1339 = vrot.lane.b32.xlu1 %v2962_v45, %s2717_s25  ;;  %1307 = vrot.lane.b32.xlu0 %v2868_v25, %s2717_s25  ;;  %v2453_v45 = vld [vmem:[%s2764_s19 + $0x61] sm:$0xff] }
 0x141   : > { %v780_v9 = vpop.permute.xlu1 %779  ;;  %v778_v10 = vpop.permute.xlu0 %777 }
 0x142   : > { %845 = vst.msk [vmem:[#allocation2 + $0xf8] sm:$0xff] %vm813_vm3, %v780_v9  ;;  %844 = vst.msk [vmem:[#allocation2 + $0xf0] sm:$0xff] %vm813_vm3, %v778_v10 }
 0x143   : > { %1341 = vrot.lane.b32.xlu1 %v2959_v44, %s2717_s25  ;;  %1309 = vrot.lane.b32.xlu0 %v2865_v24, %s2717_s25  ;;  %v2485_v24 = vld [vmem:[%s2764_s19 + $0x62] sm:$0xff] }
 0x145   : > { %v913_v14 = vpop.permute.xlu1 %912  ;;  %v911_v25 = vpop.permute.xlu0 %910 }
 0x146   : > { %1008 = vst.msk [vmem:[#allocation2 + $0x8] sm:$0xff] %vm1006_vm5, %v913_v14  ;;  %1007 = vst.msk [vmem:[#allocation2] sm:$0xff] %vm1006_vm5, %v911_v25  ;;  %v2489_v14 = vld [vmem:[%s2764_s19 + $0x92] sm:$0xff] }
 0x147   : > { %1532 = vrot.lane.b32.xlu1 %v2469_v11, %s2718_s26  ;;  %1500 = vrot.lane.b32.xlu0 %v2453_v45, %s2718_s26  ;;  %v2474_v25 = vld [vmem:[%s2764_s19 + $0x159] sm:$0xff] }
 0x149   : > { %v917_v44 = vpop.permute.xlu1 %916  ;;  %v915_v42 = vpop.permute.xlu0 %914 }
 0x14a   : > { %1010 = vst.msk [vmem:[#allocation2 + $0x18] sm:$0xff] %vm1006_vm5, %v917_v44  ;;  %1009 = vst.msk [vmem:[#allocation2 + $0x10] sm:$0xff] %vm1006_vm5, %v915_v42  ;;  %v2505_v42 = vld [vmem:[%s2764_s19 + $0x152] sm:$0xff] }
 0x14b   : > { %1502 = vrot.lane.b32.xlu1 %v2454_v15, %s2718_s26  ;;  %954 = vrot.lane.b32.xlu0 %v2469_v11, %s2715_s23 }
 0x14d   : > { %v921_v17 = vpop.permute.xlu1 %920  ;;  %v919_v55 = vpop.permute.xlu0 %918 }
 0x14e   : > { %1012 = vst.msk [vmem:[#allocation2 + $0x28] sm:$0xff] %vm1006_vm5, %v921_v17  ;;  %1011 = vst.msk [vmem:[#allocation2 + $0x20] sm:$0xff] %vm1006_vm5, %v919_v55 }
 0x14f   : > { %1693 = vrot.lane.b32.xlu1 %v2485_v24, %s2719_s4  ;;  %1534 = vrot.lane.b32.xlu0 %v2470_v43, %s2718_s26 }
 0x151   : > { %v925_v13 = vpop.permute.xlu1 %924  ;;  %v923_v54 = vpop.permute.xlu0 %922 }
 0x152   : > { %1014 = vst.msk [vmem:[#allocation2 + $0x38] sm:$0xff] %vm1006_vm5, %v925_v13  ;;  %1013 = vst.msk [vmem:[#allocation2 + $0x30] sm:$0xff] %vm1006_vm5, %v923_v54  ;;  %v2506_v13 = vld [vmem:[%s2764_s19 + $0x15a] sm:$0xff] }
 0x153   : > { %956 = vrot.lane.b32.xlu1 %v2470_v43, %s2715_s23  ;;  %1725 = vrot.lane.b32.xlu0 %v3916_v20, %s2719_s4  ;;  %v2490_v54 = vld [vmem:[%s2764_s19 + $0x9a] sm:$0xff] }
 0x155   : > { %v929_v39 = vpop.permute.xlu1 %928  ;;  %v927_v19 = vpop.permute.xlu0 %926 }
 0x156   : > { %1016 = vst.msk [vmem:[#allocation2 + $0x48] sm:$0xff] %vm1006_vm5, %v929_v39  ;;  %1015 = vst.msk [vmem:[#allocation2 + $0x40] sm:$0xff] %vm1006_vm5, %v927_v19 }
 0x157   : > { %1147 = vrot.lane.b32.xlu1 %v3916_v20, %s2716_s24  ;;  %1115 = vrot.lane.b32.xlu0 %v2485_v24, %s2716_s24 }
 0x159   : > { %v933_v38 = vpop.permute.xlu1 %932  ;;  %v931_v36 = vpop.permute.xlu0 %930 }
 0x15a   : > { %1018 = vst.msk [vmem:[#allocation2 + $0x58] sm:$0xff] %vm1006_vm5, %v933_v38  ;;  %1017 = vst.msk [vmem:[#allocation2 + $0x50] sm:$0xff] %vm1006_vm5, %v931_v36  ;;  %v2443_v36 = vld [vmem:[%s2764_s19 + $0x168] sm:$0xff] }
 0x15b   : > { %1727 = vrot.lane.b32.xlu1 %v3917_v4, %s2719_s4  ;;  %1695 = vrot.lane.b32.xlu0 %v2486_v5, %s2719_s4  ;;  %v2427_v4 = vld [vmem:[%s2764_s19 + $0xa8] sm:$0xff] }
 0x15d   : > { %v945_v37 = vpop.permute.xlu1 %944  ;;  %v943_v61 = vpop.permute.xlu0 %942 }
 0x15e   : > { %1024 = vst.msk [vmem:[#allocation2 + $0x88] sm:$0xff] %vm1006_vm5, %v945_v37  ;;  %1023 = vst.msk [vmem:[#allocation2 + $0x80] sm:$0xff] %vm1006_vm5, %v943_v61 }
 0x15f   : > { %1149 = vrot.lane.b32.xlu1 %v2408_v47, %s2716_s24  ;;  %1117 = vrot.lane.b32.xlu0 %v2486_v5, %s2716_s24 }
 0x161   : > { %v1136_v62 = vpop.permute.xlu1 %1135  ;;  %v1104_v12 = vpop.permute.xlu0 %1103 }
 0x162   : > { %1216 = vst.msk [vmem:[#allocation2 + $0x80] sm:$0xff] %vm1199_vm6, %v1136_v62  ;;  %1200 = vst.msk [vmem:[#allocation2] sm:$0xff] %vm1199_vm6, %v1104_v12  ;;  %v2444_v62 = vld [vmem:[%s2764_s19 + $0x170] sm:$0xff] }
 0x163   : > { %1343 = vrot.lane.b32.xlu1 %v2982_v49, %s2717_s25  ;;  %1311 = vrot.lane.b32.xlu0 %v2880_v27, %s2717_s25  ;;  %v2455_v49 = vld [vmem:[%s2764_s19 + $0x79] sm:$0xff]  ;;  %v2428_v12 = vld [vmem:[%s2764_s19 + $0xb0] sm:$0xff] }
 0x165   : > { %v1138_v16 = vpop.permute.xlu1 %1137  ;;  %v1106_v46 = vpop.permute.xlu0 %1105 }
 0x166   : > { %1217 = vst.msk [vmem:[#allocation2 + $0x88] sm:$0xff] %vm1199_vm6, %v1138_v16  ;;  %1201 = vst.msk [vmem:[#allocation2 + $0x8] sm:$0xff] %vm1199_vm6, %v1106_v46 }
 0x167   : > { %1345 = vrot.lane.b32.xlu1 %v2979_v48, %s2717_s25  ;;  %1313 = vrot.lane.b32.xlu0 %v2877_v26, %s2717_s25  ;;  %v2487_v26 = vld [vmem:[%s2764_s19 + $0x7a] sm:$0xff] }
 0x169   : > { %v1332_v3 = vpop.permute.xlu1 %1331  ;;  %v1300_v27 = vpop.permute.xlu0 %1299 }
 0x16a   : > { %1412 = vst.msk [vmem:[#allocation2 + $0x80] sm:$0xff] %vm1395_vm7, %v1332_v3  ;;  %1396 = vst.msk [vmem:[#allocation2] sm:$0xff] %vm1395_vm7, %v1300_v27 }
 0x16b   : > { %1536 = vrot.lane.b32.xlu1 %v2471_v63, %s2718_s26  ;;  %1504 = vrot.lane.b32.xlu0 %v2455_v49, %s2718_s26  ;;  %v2459_v49 = vld [vmem:[%s2764_s19 + $0xa9] sm:$0xff] }
 0x16d   : > { %v1334_v48 = vpop.permute.xlu1 %1333  ;;  %v1302_v21 = vpop.permute.xlu0 %1301 }
 0x16e   : > { %1413 = vst.msk [vmem:[#allocation2 + $0x88] sm:$0xff] %vm1395_vm7, %v1334_v48  ;;  %1397 = vst.msk [vmem:[#allocation2 + $0x8] sm:$0xff] %vm1395_vm7, %v1302_v21 }
 0x16f   : > { %1506 = vrot.lane.b32.xlu1 %v2456_v29, %s2718_s26  ;;  %958 = vrot.lane.b32.xlu0 %v2471_v63, %s2715_s23  ;;  %v2475_v63 = vld [vmem:[%s2764_s19 + $0x169] sm:$0xff] }
 0x171   : > { %v1525_v60 = vpop.permute.xlu1 %1524  ;;  %v1493_v1 = vpop.permute.xlu0 %1492 }
 0x172   : > { %1605 = vst.msk [vmem:[#allocation2 + $0x80] sm:$0xff] %vm1588_vm8, %v1525_v60  ;;  %1589 = vst.msk [vmem:[#allocation2] sm:$0xff] %vm1588_vm8, %v1493_v1  ;;  %v2460_v60 = vld [vmem:[%s2764_s19 + $0xb1] sm:$0xff] }
 0x173   : > { %1697 = vrot.lane.b32.xlu1 %v2487_v26, %s2719_s4  ;;  %1538 = vrot.lane.b32.xlu0 %v2472_v59, %s2718_s26 }
 0x175   : > { %v1495_v58 = vpop.permute.xlu1 %1494  ;;  %v947_v23 = vpop.permute.xlu0 %946 }
 0x176   : > { %1590 = vst.msk [vmem:[#allocation2 + $0x8] sm:$0xff] %vm1588_vm8, %v1495_v58  ;;  %v2507_v58 = vld [vmem:[%s2764_s19 + $0x16a] sm:$0xff] }
 0x177   : > { %1025 = vst.msk [vmem:[#allocation2 + $0x90] sm:$0xff] %vm1006_vm5, %v947_v23  ;;  %960 = vrot.lane.b32.xlu1 %v2472_v59, %s2715_s23  ;;  %1729 = vrot.lane.b32.xlu0 %v2503_v18, %s2719_s4  ;;  %v2476_v59 = vld [vmem:[%s2764_s19 + $0x171] sm:$0xff] }
 0x178   : > { %v2491_v23 = vld [vmem:[%s2764_s19 + $0xaa] sm:$0xff] }
 0x179   : > { %v1686_v41 = vpop.permute.xlu1 %1685  ;;  %v1527_v50 = vpop.permute.xlu0 %1526 }
 0x17a   : > { %1782 = vst.msk [vmem:[#allocation2] sm:$0xff] %vm1781_vm9, %v1686_v41 }
 0x17b   : > { %1606 = vst.msk [vmem:[#allocation2 + $0x88] sm:$0xff] %vm1588_vm8, %v1527_v50  ;;  %1151 = vrot.lane.b32.xlu1 %v2503_v18, %s2716_s24  ;;  %1119 = vrot.lane.b32.xlu0 %v2487_v26, %s2716_s24 }
 0x17d   : > { %v949_v7 = vpop.permute.xlu1 %948  ;;  %v1718_v51 = vpop.permute.xlu0 %1717 }
 0x17e   : > { %1026 = vst.msk [vmem:[#allocation2 + $0x98] sm:$0xff] %vm1006_vm5, %v949_v7 }
 0x17f   : > { %1798 = vst.msk [vmem:[#allocation2 + $0x80] sm:$0xff] %vm1781_vm9, %v1718_v51  ;;  %1731 = vrot.lane.b32.xlu1 %v2504_v22, %s2719_s4  ;;  %1699 = vrot.lane.b32.xlu0 %v2488_v40, %s2719_s4 }
 0x181   : > { %v1140_v30 = vpop.permute.xlu1 %1139  ;;  %v1108_v56 = vpop.permute.xlu0 %1107  ;;  %v1814_v6 = vld [vmem:[#allocation2] sm:$0xff] }
 0x182   : > { %1218 = vst.msk [vmem:[#allocation2 + $0x90] sm:$0xff] %vm1199_vm6, %v1140_v30  ;;  %1202 = vst.msk [vmem:[#allocation2 + $0x10] sm:$0xff] %vm1199_vm6, %v1108_v56  ;;  %2597 = vmatprep.mubr.msk.f32.mxu0 %vm1858_vm10, %v1814_v6  ;;  %v2508_v30 = vld [vmem:[%s2764_s19 + $0x172] sm:$0xff] }
 0x183   : > { %1153 = vrot.lane.b32.xlu1 %v2504_v22, %s2716_s24  ;;  %1121 = vrot.lane.b32.xlu0 %v2488_v40, %s2716_s24  ;;  %v2492_v56 = vld [vmem:[%s2764_s19 + $0xb2] sm:$0xff] }
 0x185   : > { %v1720_v28 = vpop.permute.xlu1 %1719  ;;  %v1688_v31 = vpop.permute.xlu0 %1687 }
 0x186   : > { %v1830_v0 = vld [vmem:[#allocation2 + $0x80] sm:$0xff]  ;;  %1799 = vst.msk [vmem:[#allocation2 + $0x88] sm:$0xff] %vm1781_vm9, %v1720_v28  ;;  %1783 = vst.msk [vmem:[#allocation2 + $0x8] sm:$0xff] %vm1781_vm9, %v1688_v31 }
 0x187   : > { %2621 = vmatprep.mubr.msk.f32.mxu1 %vm1858_vm10, %v1830_v0  ;;  %1347 = vrot.lane.b32.xlu1 %v3002_v53, %s2717_s25 }
 0x188   : > { %1315 = vrot.lane.b32.xlu0 %v2425_v57, %s2717_s25 }
 0x189   : > { %v1142_v32 = vpop.permute.xlu1 %1141  ;;  %v1110_v33 = vpop.permute.xlu0 %1109 }
 0x18a   : > { %1219 = vst.msk [vmem:[#allocation2 + $0x98] sm:$0xff] %vm1199_vm6, %v1142_v32  ;;  %1203 = vst.msk [vmem:[#allocation2 + $0x18] sm:$0xff] %vm1199_vm6, %v1110_v33  ;;  %v2445_v32 = vld [vmem:[%s2764_s19 + $0x180] sm:$0xff] }
 0x18b   : > { %1349 = vrot.lane.b32.xlu1 %v2999_v52, %s2717_s25  ;;  %v2458_v52 = vld [vmem:[%s2764_s19 + $0x99] sm:$0xff] }
 0x18c   : > { %1317 = vrot.lane.b32.xlu0 %v2426_v2, %s2717_s25  ;;  %v2429_v33 = vld [vmem:[%s2764_s19 + $0xc0] sm:$0xff] }
 0x18d   : > { %v1336_v8 = vpop.permute.xlu1 %1335  ;;  %v1304_v9 = vpop.permute.xlu0 %1303  ;;  %v1815_v53 = vld [vmem:[#allocation2 + $0x8] sm:$0xff] }
 0x18e   : > { %v1831_v10 = vld [vmem:[#allocation2 + $0x88] sm:$0xff]  ;;  %1414 = vst.msk [vmem:[#allocation2 + $0x90] sm:$0xff] %vm1395_vm7, %v1336_v8  ;;  %1398 = vst.msk [vmem:[#allocation2 + $0x10] sm:$0xff] %vm1395_vm7, %v1304_v9  ;;  %2598 = vmatmul.mubr.msk.f32.vlgmr.msra.gmra.mxu0 %vm1858_vm10, %v1815_v53 }
 0x18f   : > { %2622 = vmatmul.mubr.msk.f32.vlgmr.msra.gmra.mxu1 %vm1858_vm10, %v1831_v10  ;;  %1540 = vrot.lane.b32.xlu1 %v2473_v34, %s2718_s26  ;;  %v2446_v8 = vld [vmem:[%s2764_s19 + $0x188] sm:$0xff] }
 0x190   : > { %1508 = vrot.lane.b32.xlu0 %v2457_v35, %s2718_s26  ;;  %v2430_v9 = vld [vmem:[%s2764_s19 + $0xc8] sm:$0xff] }
 0x191   : > { %v1338_v11 = vpop.permute.xlu1 %1337  ;;  %v1306_v45 = vpop.permute.xlu0 %1305 }
 0x192   : > { %1415 = vst.msk [vmem:[#allocation2 + $0x98] sm:$0xff] %vm1395_vm7, %v1338_v11  ;;  %1399 = vst.msk [vmem:[#allocation2 + $0x18] sm:$0xff] %vm1395_vm7, %v1306_v45  ;;  %v2477_v45 = vld [vmem:[%s2764_s19 + $0x181] sm:$0xff] }
 0x193   : > { %1510 = vrot.lane.b32.xlu1 %v2458_v52, %s2718_s26 }
 0x194   : > { %962 = vrot.lane.b32.xlu0 %v2473_v34, %s2715_s23 }
 0x195   : > { %v1529_v15 = vpop.permute.xlu1 %1528  ;;  %v1497_v44 = vpop.permute.xlu0 %1496 }
 0x196   : > { %1607 = vst.msk [vmem:[#allocation2 + $0x90] sm:$0xff] %vm1588_vm8, %v1529_v15  ;;  %1591 = vst.msk [vmem:[#allocation2 + $0x10] sm:$0xff] %vm1588_vm8, %v1497_v44 }
 0x197   : > { %1701 = vrot.lane.b32.xlu1 %v2489_v14, %s2719_s4 }
 0x198   : > { %1542 = vrot.lane.b32.xlu0 %v2474_v25, %s2718_s26 }
 0x199   : > { %v1499_v24 = vpop.permute.xlu1 %1498  ;;  %v951_v43 = vpop.permute.xlu0 %950 }
 0x19a   : > { %1592 = vst.msk [vmem:[#allocation2 + $0x18] sm:$0xff] %vm1588_vm8, %v1499_v24  ;;  %v2478_v24 = vld [vmem:[%s2764_s19 + $0x189] sm:$0xff] }
 0x19b   : > { %1027 = vst.msk [vmem:[#allocation2 + $0xa0] sm:$0xff] %vm1006_vm5, %v951_v43  ;;  %964 = vrot.lane.b32.xlu1 %v2474_v25, %s2715_s23  ;;  %v2462_v43 = vld [vmem:[%s2764_s19 + $0xc9] sm:$0xff] }
 0x19c   : > { %1733 = vrot.lane.b32.xlu0 %v2505_v42, %s2719_s4 }
 0x19d   : > { %v1690_v17 = vpop.permute.xlu1 %1689  ;;  %v1531_v55 = vpop.permute.xlu0 %1530 }
 0x19e   : > { %1784 = vst.msk [vmem:[#allocation2 + $0x10] sm:$0xff] %vm1781_vm9, %v1690_v17 }
 0x19f   : > { %1608 = vst.msk [vmem:[#allocation2 + $0x98] sm:$0xff] %vm1588_vm8, %v1531_v55  ;;  %1155 = vrot.lane.b32.xlu1 %v2505_v42, %s2716_s24 }
 0x1a0   : > { %1123 = vrot.lane.b32.xlu0 %v2489_v14, %s2716_s24  ;;  %v2461_v14 = vld [vmem:[%s2764_s19 + $0xc1] sm:$0xff] }
 0x1a1   : > { %v953_v20 = vpop.permute.xlu1 %952  ;;  %v1722_v39 = vpop.permute.xlu0 %1721 }
 0x1a2   : > { %1028 = vst.msk [vmem:[#allocation2 + $0xa8] sm:$0xff] %vm1006_vm5, %v953_v20 }
 0x1a3   : > { %1800 = vst.msk [vmem:[#allocation2 + $0x90] sm:$0xff] %vm1781_vm9, %v1722_v39  ;;  %1735 = vrot.lane.b32.xlu1 %v2506_v13, %s2719_s4 }
 0x1a4   : > { %1703 = vrot.lane.b32.xlu0 %v2490_v54, %s2719_s4 }
 0x1a5   : > { %v1144_v19 = vpop.permute.xlu1 %1143  ;;  %v1112_v5 = vpop.permute.xlu0 %1111  ;;  %v1816_v38 = vld [vmem:[#allocation2 + $0x10] sm:$0xff] }
 0x1a6   : > { %1220 = vst.msk [vmem:[#allocation2 + $0xa0] sm:$0xff] %vm1199_vm6, %v1144_v19  ;;  %1204 = vst.msk [vmem:[#allocation2 + $0x20] sm:$0xff] %vm1199_vm6, %v1112_v5  ;;  %2600 = vmatprep.mubr.msk.f32.mxu0 %vm1858_vm10, %v1816_v38 }
 0x1a7   : > { %1157 = vrot.lane.b32.xlu1 %v2506_v13, %s2716_s24  ;;  %v2509_v13 = vld [vmem:[%s2764_s19 + $0x182] sm:$0xff] }
 0x1a8   : > { %1125 = vrot.lane.b32.xlu0 %v2490_v54, %s2716_s24  ;;  %v2493_v54 = vld [vmem:[%s2764_s19 + $0xc2] sm:$0xff] }
 0x1a9   : > { %v1724_v47 = vpop.permute.xlu1 %1723  ;;  %v1692_v37 = vpop.permute.xlu0 %1691 }
 0x1aa   : > { %v1832_v61 = vld [vmem:[#allocation2 + $0x90] sm:$0xff]  ;;  %1801 = vst.msk [vmem:[#allocation2 + $0x98] sm:$0xff] %vm1781_vm9, %v1724_v47  ;;  %1785 = vst.msk [vmem:[#allocation2 + $0x18] sm:$0xff] %vm1781_vm9, %v1692_v37 }
 0x1ab   : > { %2624 = vmatprep.mubr.msk.f32.mxu1 %vm1858_vm10, %v1832_v61  ;;  %1351 = vrot.lane.b32.xlu1 %v2443_v36, %s2717_s25  ;;  %v2510_v47 = vld [vmem:[%s2764_s19 + $0x18a] sm:$0xff] }
 0x1ac   : > { %1319 = vrot.lane.b32.xlu0 %v2427_v4, %s2717_s25  ;;  %v2494_v37 = vld [vmem:[%s2764_s19 + $0xca] sm:$0xff] }
 0x1ad   : > { %v1146_v16 = vpop.permute.xlu1 %1145  ;;  %v1114_v46 = vpop.permute.xlu0 %1113 }
 0x1ae   : > { %1221 = vst.msk [vmem:[#allocation2 + $0xa8] sm:$0xff] %vm1199_vm6, %v1146_v16  ;;  %1205 = vst.msk [vmem:[#allocation2 + $0x28] sm:$0xff] %vm1199_vm6, %v1114_v46 }
 0x1af   : > { %1353 = vrot.lane.b32.xlu1 %v2444_v62, %s2717_s25 }
 0x1b0   : > { %1321 = vrot.lane.b32.xlu0 %v2428_v12, %s2717_s25 }
 0x1b1   : > { %v1340_v3 = vpop.permute.xlu1 %1339  ;;  %v1308_v27 = vpop.permute.xlu0 %1307  ;;  %v1817_v29 = vld [vmem:[#allocation2 + $0x18] sm:$0xff] }
 0x1b2   : > { %v1833_v48 = vld [vmem:[#allocation2 + $0x98] sm:$0xff]  ;;  %1416 = vst.msk [vmem:[#allocation2 + $0xa0] sm:$0xff] %vm1395_vm7, %v1340_v3  ;;  %1400 = vst.msk [vmem:[#allocation2 + $0x20] sm:$0xff] %vm1395_vm7, %v1308_v27  ;;  %2601 = vmatmul.mubr.msk.f32.gmra.mxu0 %vm1858_vm10, %v1817_v29 }
 0x1b3   : > { %2625 = vmatmul.mubr.msk.f32.gmra.mxu1 %vm1858_vm10, %v1833_v48  ;;  %1544 = vrot.lane.b32.xlu1 %v2475_v63, %s2718_s26 }
 0x1b4   : > { %1512 = vrot.lane.b32.xlu0 %v2459_v49, %s2718_s26 }
 0x1b5   : > { %v1342_v21 = vpop.permute.xlu1 %1341  ;;  %v1310_v26 = vpop.permute.xlu0 %1309 }
 0x1b6   : > { %1417 = vst.msk [vmem:[#allocation2 + $0xa8] sm:$0xff] %vm1395_vm7, %v1342_v21  ;;  %1401 = vst.msk [vmem:[#allocation2 + $0x28] sm:$0xff] %vm1395_vm7, %v1310_v26  ;;  %v2448_v21 = vld [vmem:[%s2764_s19 + $0x1a0] sm:$0xff] }
 0x1b7   : > { %966 = vrot.lane.b32.xlu1 %v2475_v63, %s2715_s23  ;;  %v2447_v63 = vld [vmem:[%s2764_s19 + $0x198] sm:$0xff]  ;;  %v2432_v26 = vld [vmem:[%s2764_s19 + $0xe0] sm:$0xff] }
 0x1b8   : > { %934 = vrot.lane.b32.xlu0 %v2459_v49, %s2715_s23  ;;  %v2431_v49 = vld [vmem:[%s2764_s19 + $0xd8] sm:$0xff] }
 0x1b9   : > { %v1533_v1 = vpop.permute.xlu1 %1532  ;;  %v1501_v18 = vpop.permute.xlu0 %1500 }
 0x1ba   : > { %1609 = vst.msk [vmem:[#allocation2 + $0xa0] sm:$0xff] %vm1588_vm8, %v1533_v1  ;;  %1593 = vst.msk [vmem:[#allocation2 + $0x20] sm:$0xff] %vm1588_vm8, %v1501_v18  ;;  %v2479_v1 = vld [vmem:[%s2764_s19 + $0x199] sm:$0xff] }
 0x1bb   : > { %1546 = vrot.lane.b32.xlu1 %v2476_v59, %s2718_s26  ;;  %v2463_v18 = vld [vmem:[%s2764_s19 + $0xd9] sm:$0xff] }
 0x1bc   : > { %1514 = vrot.lane.b32.xlu0 %v2460_v60, %s2718_s26 }
 0x1bd   : > { %v1503_v41 = vpop.permute.xlu1 %1502  ;;  %v955_v50 = vpop.permute.xlu0 %954 }
 0x1be   : > { %1594 = vst.msk [vmem:[#allocation2 + $0x28] sm:$0xff] %vm1588_vm8, %v1503_v41  ;;  %v2480_v41 = vld [vmem:[%s2764_s19 + $0x1a1] sm:$0xff] }
 0x1bf   : > { %1029 = vst.msk [vmem:[#allocation2 + $0xb0] sm:$0xff] %vm1006_vm5, %v955_v50  ;;  %1737 = vrot.lane.b32.xlu1 %v2507_v58, %s2719_s4  ;;  %v2464_v50 = vld [vmem:[%s2764_s19 + $0xe1] sm:$0xff] }
 0x1c0   : > { %1705 = vrot.lane.b32.xlu0 %v2491_v23, %s2719_s4 }
 0x1c1   : > { %v1694_v22 = vpop.permute.xlu1 %1693  ;;  %v1535_v40 = vpop.permute.xlu0 %1534 }
 0x1c2   : > { %1786 = vst.msk [vmem:[#allocation2 + $0x20] sm:$0xff] %vm1781_vm9, %v1694_v22 }
 0x1c3   : > { %1610 = vst.msk [vmem:[#allocation2 + $0xa8] sm:$0xff] %vm1588_vm8, %v1535_v40  ;;  %968 = vrot.lane.b32.xlu1 %v2476_v59, %s2715_s23 }
 0x1c4   : > { %936 = vrot.lane.b32.xlu0 %v2460_v60, %s2715_s23 }
 0x1c5   : > { %v957_v7 = vpop.permute.xlu1 %956  ;;  %v1726_v51 = vpop.permute.xlu0 %1725 }
 0x1c6   : > { %1030 = vst.msk [vmem:[#allocation2 + $0xb8] sm:$0xff] %vm1006_vm5, %v957_v7  ;;  %v2511_v7 = vld [vmem:[%s2764_s19 + $0x19a] sm:$0xff] }
 0x1c7   : > { %1802 = vst.msk [vmem:[#allocation2 + $0xa0] sm:$0xff] %vm1781_vm9, %v1726_v51  ;;  %1159 = vrot.lane.b32.xlu1 %v2507_v58, %s2716_s24  ;;  %v2495_v51 = vld [vmem:[%s2764_s19 + $0xda] sm:$0xff] }
 0x1c8   : > { %1127 = vrot.lane.b32.xlu0 %v2491_v23, %s2716_s24 }
 0x1c9   : > { %v1148_v6 = vpop.permute.xlu1 %1147  ;;  %v1116_v57 = vpop.permute.xlu0 %1115  ;;  %v1818_v28 = vld [vmem:[#allocation2 + $0x20] sm:$0xff] }
 0x1ca   : > { %1222 = vst.msk [vmem:[#allocation2 + $0xb0] sm:$0xff] %vm1199_vm6, %v1148_v6  ;;  %1206 = vst.msk [vmem:[#allocation2 + $0x30] sm:$0xff] %vm1199_vm6, %v1116_v57  ;;  %2603 = vmatprep.mubr.msk.f32.mxu0 %vm1858_vm10, %v1818_v28  ;;  %v2512_v6 = vld [vmem:[%s2764_s19 + $0x1a2] sm:$0xff] }
 0x1cb   : > { %1739 = vrot.lane.b32.xlu1 %v2508_v30, %s2719_s4  ;;  %v2496_v57 = vld [vmem:[%s2764_s19 + $0xe2] sm:$0xff] }
 0x1cc   : > { %1707 = vrot.lane.b32.xlu0 %v2492_v56, %s2719_s4 }
 0x1cd   : > { %v1728_v31 = vpop.permute.xlu1 %1727  ;;  %v1696_v0 = vpop.permute.xlu0 %1695 }
 0x1ce   : > { %v1834_v2 = vld [vmem:[#allocation2 + $0xa0] sm:$0xff]  ;;  %1803 = vst.msk [vmem:[#allocation2 + $0xa8] sm:$0xff] %vm1781_vm9, %v1728_v31  ;;  %1787 = vst.msk [vmem:[#allocation2 + $0x28] sm:$0xff] %vm1781_vm9, %v1696_v0 }
 0x1cf   : > { %2627 = vmatprep.mubr.msk.f32.mxu1 %vm1858_vm10, %v1834_v2  ;;  %1161 = vrot.lane.b32.xlu1 %v2508_v30, %s2716_s24 }
 0x1d0   : > { %1129 = vrot.lane.b32.xlu0 %v2492_v56, %s2716_s24 }
 0x1d1   : > { %v1150_v34 = vpop.permute.xlu1 %1149  ;;  %v1118_v35 = vpop.permute.xlu0 %1117 }
 0x1d2   : > { %1223 = vst.msk [vmem:[#allocation2 + $0xb8] sm:$0xff] %vm1199_vm6, %v1150_v34  ;;  %1207 = vst.msk [vmem:[#allocation2 + $0x38] sm:$0xff] %vm1199_vm6, %v1118_v35 }
 0x1d3   : > { %1355 = vrot.lane.b32.xlu1 %v2445_v32, %s2717_s25 }
 0x1d4   : > { %1323 = vrot.lane.b32.xlu0 %v2429_v33, %s2717_s25 }
 0x1d5   : > { %v1344_v53 = vpop.permute.xlu1 %1343  ;;  %v1312_v10 = vpop.permute.xlu0 %1311  ;;  %v1819_v52 = vld [vmem:[#allocation2 + $0x28] sm:$0xff] }
 0x1d6   : > { %v1835_v11 = vld [vmem:[#allocation2 + $0xa8] sm:$0xff]  ;;  %1418 = vst.msk [vmem:[#allocation2 + $0xb0] sm:$0xff] %vm1395_vm7, %v1344_v53  ;;  %1402 = vst.msk [vmem:[#allocation2 + $0x30] sm:$0xff] %vm1395_vm7, %v1312_v10  ;;  %2604 = vmatmul.mubr.msk.f32.gmra.mxu0 %vm1858_vm10, %v1819_v52 }
 0x1d7   : > { %2628 = vmatmul.mubr.msk.f32.gmra.mxu1 %vm1858_vm10, %v1835_v11  ;;  %1357 = vrot.lane.b32.xlu1 %v2446_v8, %s2717_s25 }
 0x1d8   : > { %1325 = vrot.lane.b32.xlu0 %v2430_v9, %s2717_s25 }
 0x1d9   : > { %v1346_v25 = vpop.permute.xlu1 %1345  ;;  %v1314_v15 = vpop.permute.xlu0 %1313 }
 0x1da   : > { %1419 = vst.msk [vmem:[#allocation2 + $0xb8] sm:$0xff] %vm1395_vm7, %v1346_v25  ;;  %1403 = vst.msk [vmem:[#allocation2 + $0x38] sm:$0xff] %vm1395_vm7, %v1314_v15 }
 0x1db   : > { %1548 = vrot.lane.b32.xlu1 %v2477_v45, %s2718_s26 }
 0x1dc   : > { %1516 = vrot.lane.b32.xlu0 %v2461_v14, %s2718_s26 }
 0x1dd   : > { %v1537_v44 = vpop.permute.xlu1 %1536  ;;  %v1505_v42 = vpop.permute.xlu0 %1504 }
 0x1de   : > { %1611 = vst.msk [vmem:[#allocation2 + $0xb0] sm:$0xff] %vm1588_vm8, %v1537_v44  ;;  %1595 = vst.msk [vmem:[#allocation2 + $0x30] sm:$0xff] %vm1588_vm8, %v1505_v42 }
 0x1df   : > { %970 = vrot.lane.b32.xlu1 %v2477_v45, %s2715_s23 }
 0x1e0   : > { %938 = vrot.lane.b32.xlu0 %v2461_v14, %s2715_s23 }
 0x1e1   : > { %v1507_v17 = vpop.permute.xlu1 %1506  ;;  %v959_v55 = vpop.permute.xlu0 %958 }
 0x1e2   : > { %1596 = vst.msk [vmem:[#allocation2 + $0x38] sm:$0xff] %vm1588_vm8, %v1507_v17 }
 0x1e3   : > { %1031 = vst.msk [vmem:[#allocation2 + $0xc0] sm:$0xff] %vm1006_vm5, %v959_v55  ;;  %1550 = vrot.lane.b32.xlu1 %v2478_v24, %s2718_s26 }
 0x1e4   : > { %1518 = vrot.lane.b32.xlu0 %v2462_v43, %s2718_s26 }
 0x1e5   : > { %v1698_v20 = vpop.permute.xlu1 %1697  ;;  %v1539_v39 = vpop.permute.xlu0 %1538 }
 0x1e6   : > { %1788 = vst.msk [vmem:[#allocation2 + $0x30] sm:$0xff] %vm1781_vm9, %v1698_v20 }
 0x1e7   : > { %1612 = vst.msk [vmem:[#allocation2 + $0xb8] sm:$0xff] %vm1588_vm8, %v1539_v39  ;;  %1741 = vrot.lane.b32.xlu1 %v2509_v13, %s2719_s4 }
 0x1e8   : > { %1709 = vrot.lane.b32.xlu0 %v2493_v54, %s2719_s4 }
 0x1e9   : > { %v961_v19 = vpop.permute.xlu1 %960  ;;  %v1730_v5 = vpop.permute.xlu0 %1729 }
 0x1ea   : > { %1032 = vst.msk [vmem:[#allocation2 + $0xc8] sm:$0xff] %vm1006_vm5, %v961_v19 }
 0x1eb   : > { %1804 = vst.msk [vmem:[#allocation2 + $0xb0] sm:$0xff] %vm1781_vm9, %v1730_v5  ;;  %972 = vrot.lane.b32.xlu1 %v2478_v24, %s2715_s23 }
 0x1ec   : > { %940 = vrot.lane.b32.xlu0 %v2462_v43, %s2715_s23 }
 0x1ed   : > { %v1152_v38 = vpop.permute.xlu1 %1151  ;;  %v1120_v36 = vpop.permute.xlu0 %1119  ;;  %v1820_v4 = vld [vmem:[#allocation2 + $0x30] sm:$0xff] }
 0x1ee   : > { %1224 = vst.msk [vmem:[#allocation2 + $0xc0] sm:$0xff] %vm1199_vm6, %v1152_v38  ;;  %1208 = vst.msk [vmem:[#allocation2 + $0x40] sm:$0xff] %vm1199_vm6, %v1120_v36  ;;  %2606 = vmatprep.mubr.msk.f32.mxu0 %vm1858_vm10, %v1820_v4 }
 0x1ef   : > { %1163 = vrot.lane.b32.xlu1 %v2509_v13, %s2716_s24 }
 0x1f0   : > { %1131 = vrot.lane.b32.xlu0 %v2493_v54, %s2716_s24 }
 0x1f1   : > { %v1732_v61 = vpop.permute.xlu1 %1731  ;;  %v1700_v62 = vpop.permute.xlu0 %1699 }
 0x1f2   : > { %v1836_v12 = vld [vmem:[#allocation2 + $0xb0] sm:$0xff]  ;;  %1805 = vst.msk [vmem:[#allocation2 + $0xb8] sm:$0xff] %vm1781_vm9, %v1732_v61  ;;  %1789 = vst.msk [vmem:[#allocation2 + $0x38] sm:$0xff] %vm1781_vm9, %v1700_v62 }
 0x1f3   : > { %2630 = vmatprep.mubr.msk.f32.mxu1 %vm1858_vm10, %v1836_v12  ;;  %1743 = vrot.lane.b32.xlu1 %v2510_v47, %s2719_s4 }
 0x1f4   : > { %1711 = vrot.lane.b32.xlu0 %v2494_v37, %s2719_s4 }
 0x1f5   : > { %v1154_v16 = vpop.permute.xlu1 %1153  ;;  %v1122_v46 = vpop.permute.xlu0 %1121 }
 0x1f6   : > { %1225 = vst.msk [vmem:[#allocation2 + $0xc8] sm:$0xff] %vm1199_vm6, %v1154_v16  ;;  %1209 = vst.msk [vmem:[#allocation2 + $0x48] sm:$0xff] %vm1199_vm6, %v1122_v46 }
 0x1f7   : > { %1165 = vrot.lane.b32.xlu1 %v2510_v47, %s2716_s24 }
 0x1f8   : > { %1133 = vrot.lane.b32.xlu0 %v2494_v37, %s2716_s24 }
 0x1f9   : > { %v1348_v3 = vpop.permute.xlu1 %1347  ;;  %v1821_v29 = vld [vmem:[#allocation2 + $0x38] sm:$0xff] }
 0x1fa   : > { %v1316_v27 = vpop.permute.xlu0 %1315  ;;  %v1837_v48 = vld [vmem:[#allocation2 + $0xb8] sm:$0xff]  ;;  %1420 = vst.msk [vmem:[#allocation2 + $0xc0] sm:$0xff] %vm1395_vm7, %v1348_v3  ;;  %2607 = vmatmul.mubr.msk.f32.gmra.mxu0 %vm1858_vm10, %v1821_v29 }
 0x1fb   : > { %1404 = vst.msk [vmem:[#allocation2 + $0x40] sm:$0xff] %vm1395_vm7, %v1316_v27  ;;  %2631 = vmatmul.mubr.msk.f32.gmra.mxu1 %vm1858_vm10, %v1837_v48  ;;  %1359 = vrot.lane.b32.xlu1 %v2447_v63, %s2717_s25  ;;  %v3767_v63 = vld [vmem:[%s3885_s2] ss:$0 sm:$0xff] }
 0x1fc   : > { %1327 = vrot.lane.b32.xlu0 %v2431_v49, %s2717_s25 }
 0x1fd   : > { %v1350_v59 = vpop.permute.xlu1 %1349 }
 0x1fe   : > { %v1318_v60 = vpop.permute.xlu0 %1317  ;;  %1421 = vst.msk [vmem:[#allocation2 + $0xc8] sm:$0xff] %vm1395_vm7, %v1350_v59 }
 0x1ff   : > { %1405 = vst.msk [vmem:[#allocation2 + $0x48] sm:$0xff] %vm1395_vm7, %v1318_v60  ;;  %1361 = vrot.lane.b32.xlu1 %v2448_v21, %s2717_s25 }
 0x200   : > { %1329 = vrot.lane.b32.xlu0 %v2432_v26, %s2717_s25 }
 0x201   : > { %v1541_v58 = vpop.permute.xlu1 %1540 }
 0x202   : > { %v1509_v23 = vpop.permute.xlu0 %1508  ;;  %1613 = vst.msk [vmem:[#allocation2 + $0xc0] sm:$0xff] %vm1588_vm8, %v1541_v58 }
 0x203   : > { %1597 = vst.msk [vmem:[#allocation2 + $0x40] sm:$0xff] %vm1588_vm8, %v1509_v23  ;;  %1552 = vrot.lane.b32.xlu1 %v2479_v1, %s2718_s26 }
 0x204   : > { %1520 = vrot.lane.b32.xlu0 %v2463_v18, %s2718_s26 }
 0x205   : > { %v1511_v22 = vpop.permute.xlu1 %1510 }
 0x206   : > { %v963_v40 = vpop.permute.xlu0 %962  ;;  %1598 = vst.msk [vmem:[#allocation2 + $0x48] sm:$0xff] %vm1588_vm8, %v1511_v22 }
 0x207   : > { %1033 = vst.msk [vmem:[#allocation2 + $0xd0] sm:$0xff] %vm1006_vm5, %v963_v40  ;;  %1554 = vrot.lane.b32.xlu1 %v2480_v41, %s2718_s26 }
 0x208   : > { %1522 = vrot.lane.b32.xlu0 %v2464_v50, %s2718_s26 }
 0x209   : > { %v1702_v30 = vpop.permute.xlu1 %1701 }
 0x20a   : > { %v1543_v56 = vpop.permute.xlu0 %1542  ;;  %1790 = vst.msk [vmem:[#allocation2 + $0x40] sm:$0xff] %vm1781_vm9, %v1702_v30 }
 0x20b   : > { %1614 = vst.msk [vmem:[#allocation2 + $0xc8] sm:$0xff] %vm1588_vm8, %v1543_v56  ;;  %1745 = vrot.lane.b32.xlu1 %v2511_v7, %s2719_s4 }
 0x20c   : > { %1713 = vrot.lane.b32.xlu0 %v2495_v51, %s2719_s4 }
 0x20d   : > { %v965_v28 = vpop.permute.xlu1 %964 }
 0x20e   : > { %v1734_v31 = vpop.permute.xlu0 %1733  ;;  %1034 = vst.msk [vmem:[#allocation2 + $0xd8] sm:$0xff] %vm1006_vm5, %v965_v28 }
 0x20f   : > { %1806 = vst.msk [vmem:[#allocation2 + $0xc0] sm:$0xff] %vm1781_vm9, %v1734_v31  ;;  %1747 = vrot.lane.b32.xlu1 %v2512_v6, %s2719_s4 }
 0x210   : > { %1715 = vrot.lane.b32.xlu0 %v2496_v57, %s2719_s4 }
 0x211   : > { %v1156_v0 = vpop.permute.xlu1 %1155  ;;  %v1822_v32 = vld [vmem:[#allocation2 + $0x40] sm:$0xff] }
 0x212   : > { %v1124_v2 = vpop.permute.xlu0 %1123  ;;  %1226 = vst.msk [vmem:[#allocation2 + $0xd0] sm:$0xff] %vm1199_vm6, %v1156_v0  ;;  %2609 = vmatprep.mubr.msk.f32.mxu0 %vm1858_vm10, %v1822_v32 }
 0x213   : > { %1210 = vst.msk [vmem:[#allocation2 + $0x50] sm:$0xff] %vm1199_vm6, %v1124_v2 }
 0x215   : > { %v1736_v33 = vpop.permute.xlu1 %1735 }
 0x216   : > { %v1704_v34 = vpop.permute.xlu0 %1703  ;;  %v1838_v35 = vld [vmem:[#allocation2 + $0xc0] sm:$0xff]  ;;  %1807 = vst.msk [vmem:[#allocation2 + $0xc8] sm:$0xff] %vm1781_vm9, %v1736_v33 }
 0x217   : > { %1791 = vst.msk [vmem:[#allocation2 + $0x48] sm:$0xff] %vm1781_vm9, %v1704_v34  ;;  %2633 = vmatprep.mubr.msk.f32.mxu1 %vm1858_vm10, %v1838_v35 }
 0x219   : > { %v1158_v8 = vpop.permute.xlu1 %1157 }
 0x21a   : > { %v1126_v9 = vpop.permute.xlu0 %1125  ;;  %1227 = vst.msk [vmem:[#allocation2 + $0xd8] sm:$0xff] %vm1199_vm6, %v1158_v8 }
 0x21b   : > { %1211 = vst.msk [vmem:[#allocation2 + $0x58] sm:$0xff] %vm1199_vm6, %v1126_v9 }
 0x21d   : > { %v1352_v53 = vpop.permute.xlu1 %1351  ;;  %v1839_v11 = vld [vmem:[#allocation2 + $0xc8] sm:$0xff] }
 0x21e   : > { %v1320_v10 = vpop.permute.xlu0 %1319  ;;  %v1823_v52 = vld [vmem:[#allocation2 + $0x48] sm:$0xff]  ;;  %1422 = vst.msk [vmem:[#allocation2 + $0xd0] sm:$0xff] %vm1395_vm7, %v1352_v53  ;;  %2634 = vmatmul.mubr.msk.f32.gmra.mxu1 %vm1858_vm10, %v1839_v11 }
 0x21f   : > { %1406 = vst.msk [vmem:[#allocation2 + $0x50] sm:$0xff] %vm1395_vm7, %v1320_v10  ;;  %2610 = vmatmul.mubr.msk.f32.gmra.mxu0 %vm1858_vm10, %v1823_v52 }
 0x221   : > { %v1354_v45 = vpop.permute.xlu1 %1353 }
 0x222   : > { %v1322_v14 = vpop.permute.xlu0 %1321  ;;  %1423 = vst.msk [vmem:[#allocation2 + $0xd8] sm:$0xff] %vm1395_vm7, %v1354_v45 }
 0x223   : > { %1407 = vst.msk [vmem:[#allocation2 + $0x58] sm:$0xff] %vm1395_vm7, %v1322_v14 }
 0x225   : > { %v1545_v25 = vpop.permute.xlu1 %1544 }
 0x226   : > { %v1513_v15 = vpop.permute.xlu0 %1512  ;;  %1615 = vst.msk [vmem:[#allocation2 + $0xd0] sm:$0xff] %vm1588_vm8, %v1545_v25 }
 0x227   : > { %1599 = vst.msk [vmem:[#allocation2 + $0x50] sm:$0xff] %vm1588_vm8, %v1513_v15 }
 0x229   : > { %v967_v44 = vpop.permute.xlu1 %966 }
 0x22a   : > { %v935_v42 = vpop.permute.xlu0 %934  ;;  %1035 = vst.msk [vmem:[#allocation2 + $0xe0] sm:$0xff] %vm1006_vm5, %v967_v44 }
 0x22b   : > { %1019 = vst.msk [vmem:[#allocation2 + $0x60] sm:$0xff] %vm1006_vm5, %v935_v42 }
 0x22d   : > { %v1547_v24 = vpop.permute.xlu1 %1546 }
 0x22e   : > { %v1515_v43 = vpop.permute.xlu0 %1514  ;;  %1616 = vst.msk [vmem:[#allocation2 + $0xd8] sm:$0xff] %vm1588_vm8, %v1547_v24 }
 0x22f   : > { %1600 = vst.msk [vmem:[#allocation2 + $0x58] sm:$0xff] %vm1588_vm8, %v1515_v43 }
 0x231   : > { %v1738_v17 = vpop.permute.xlu1 %1737 }
 0x232   : > { %v1706_v55 = vpop.permute.xlu0 %1705  ;;  %1808 = vst.msk [vmem:[#allocation2 + $0xd0] sm:$0xff] %vm1781_vm9, %v1738_v17 }
 0x233   : > { %1792 = vst.msk [vmem:[#allocation2 + $0x50] sm:$0xff] %vm1781_vm9, %v1706_v55 }
 0x235   : > { %v969_v13 = vpop.permute.xlu1 %968 }
 0x236   : > { %v937_v54 = vpop.permute.xlu0 %936  ;;  %1036 = vst.msk [vmem:[#allocation2 + $0xe8] sm:$0xff] %vm1006_vm5, %v969_v13 }
 0x237   : > { %1020 = vst.msk [vmem:[#allocation2 + $0x68] sm:$0xff] %vm1006_vm5, %v937_v54 }
 0x239   : > { %v1160_v20 = vpop.permute.xlu1 %1159  ;;  %v1840_v5 = vld [vmem:[#allocation2 + $0xd0] sm:$0xff] }
 0x23a   : > { %v1128_v39 = vpop.permute.xlu0 %1127  ;;  %v1824_v19 = vld [vmem:[#allocation2 + $0x50] sm:$0xff]  ;;  %1228 = vst.msk [vmem:[#allocation2 + $0xe0] sm:$0xff] %vm1199_vm6, %v1160_v20  ;;  %2636 = vmatprep.mubr.msk.f32.mxu1 %vm1858_vm10, %v1840_v5 }
 0x23b   : > { %1212 = vst.msk [vmem:[#allocation2 + $0x60] sm:$0xff] %vm1199_vm6, %v1128_v39  ;;  %2612 = vmatprep.mubr.msk.f32.mxu0 %vm1858_vm10, %v1824_v19 }
 0x23d   : > { %v1740_v38 = vpop.permute.xlu1 %1739 }
 0x23e   : > { %v1708_v36 = vpop.permute.xlu0 %1707  ;;  %1809 = vst.msk [vmem:[#allocation2 + $0xd8] sm:$0xff] %vm1781_vm9, %v1740_v38 }
 0x23f   : > { %1793 = vst.msk [vmem:[#allocation2 + $0x58] sm:$0xff] %vm1781_vm9, %v1708_v36 }
 0x241   : > { %v1162_v4 = vpop.permute.xlu1 %1161 }
 0x242   : > { %v1130_v47 = vpop.permute.xlu0 %1129  ;;  %1229 = vst.msk [vmem:[#allocation2 + $0xe8] sm:$0xff] %vm1199_vm6, %v1162_v4 }
 0x243   : > { %1213 = vst.msk [vmem:[#allocation2 + $0x68] sm:$0xff] %vm1199_vm6, %v1130_v47 }
 0x245   : > { %v1356_v37 = vpop.permute.xlu1 %1355  ;;  %v1841_v12 = vld [vmem:[#allocation2 + $0xd8] sm:$0xff] }
 0x246   : > { %v1324_v61 = vpop.permute.xlu0 %1323  ;;  %v1825_v62 = vld [vmem:[#allocation2 + $0x58] sm:$0xff]  ;;  %1424 = vst.msk [vmem:[#allocation2 + $0xe0] sm:$0xff] %vm1395_vm7, %v1356_v37  ;;  %2637 = vmatmul.mubr.msk.f32.gmra.mxu1 %vm1858_vm10, %v1841_v12 }
 0x247   : > { %1408 = vst.msk [vmem:[#allocation2 + $0x60] sm:$0xff] %vm1395_vm7, %v1324_v61  ;;  %2613 = vmatmul.mubr.msk.f32.gmra.mxu0 %vm1858_vm10, %v1825_v62 }
 0x249   : > { %v1358_v16 = vpop.permute.xlu1 %1357 }
 0x24a   : > { %v1326_v46 = vpop.permute.xlu0 %1325  ;;  %1425 = vst.msk [vmem:[#allocation2 + $0xe8] sm:$0xff] %vm1395_vm7, %v1358_v16 }
 0x24b   : > { %1409 = vst.msk [vmem:[#allocation2 + $0x68] sm:$0xff] %vm1395_vm7, %v1326_v46 }
 0x24d   : > { %v1549_v49 = vpop.permute.xlu1 %1548 }
 0x24e   : > { %v1517_v3 = vpop.permute.xlu0 %1516  ;;  %1617 = vst.msk [vmem:[#allocation2 + $0xe0] sm:$0xff] %vm1588_vm8, %v1549_v49  ;;  %v2599_v27 = vpop.f32.mrf.mxu0 }
 0x24f   : > { %1601 = vst.msk [vmem:[#allocation2 + $0x60] sm:$0xff] %vm1588_vm8, %v1517_v3  ;;  %v2623_v29 = vpop.f32.mrf.mxu1  ;;  %v2031_v48 = vadd.f32 %v2599_v27, %v3767_v63 }
 0x250   : > { %v2111_v21 = vadd.f32 %v2623_v29, %v3767_v63  ;;  %v2025_v26 = vpop.f32.mrf.mxu0 }
 0x251   : > { %v2105_v59 = vpop.f32.mrf.mxu1  ;;  %2185 = vst [vmem:[%s3774_s20 + $0x8] sm:$0xff] %v2031_v48  ;;  %v2026_v60 = vadd.f32 %v3767_v63, %v2025_v26  ;;  %v971_v18 = vpop.permute.xlu1 %970 }
 0x252   : > { %2201 = vst [vmem:[%s3774_s20 + $0x88] sm:$0xff] %v2111_v21  ;;  %v2106_v1 = vadd.f32 %v3767_v63, %v2105_v59  ;;  %v939_v58 = vpop.permute.xlu0 %938  ;;  %1037 = vst.msk [vmem:[#allocation2 + $0xf0] sm:$0xff] %vm1006_vm5, %v971_v18 }
 0x253   : > { %1021 = vst.msk [vmem:[#allocation2 + $0x70] sm:$0xff] %vm1006_vm5, %v939_v58  ;;  %2184 = vst [vmem:[%s3774_s20] sm:$0xff] %v2026_v60 }
 0x254   : > { %2200 = vst [vmem:[%s3774_s20 + $0x80] sm:$0xff] %v2106_v1 }
 0x255   : > { %v1551_v23 = vpop.permute.xlu1 %1550 }
 0x256   : > { %v1519_v41 = vpop.permute.xlu0 %1518  ;;  %1618 = vst.msk [vmem:[#allocation2 + $0xe8] sm:$0xff] %vm1588_vm8, %v1551_v23 }
 0x257   : > { %1602 = vst.msk [vmem:[#allocation2 + $0x68] sm:$0xff] %vm1588_vm8, %v1519_v41 }
 0x259   : > { %v1742_v50 = vpop.permute.xlu1 %1741 }
 0x25a   : > { %v1710_v22 = vpop.permute.xlu0 %1709  ;;  %1810 = vst.msk [vmem:[#allocation2 + $0xe0] sm:$0xff] %vm1781_vm9, %v1742_v50 }
 0x25b   : > { %1794 = vst.msk [vmem:[#allocation2 + $0x60] sm:$0xff] %vm1781_vm9, %v1710_v22 }
 0x25d   : > { %v973_v40 = vpop.permute.xlu1 %972 }
 0x25e   : > { %v941_v7 = vpop.permute.xlu0 %940  ;;  %1038 = vst.msk [vmem:[#allocation2 + $0xf8] sm:$0xff] %vm1006_vm5, %v973_v40 }
 0x25f   : > { %1022 = vst.msk [vmem:[#allocation2 + $0x78] sm:$0xff] %vm1006_vm5, %v941_v7 }
 0x261   : > { %v1164_v51 = vpop.permute.xlu1 %1163  ;;  %v1842_v6 = vld [vmem:[#allocation2 + $0xe0] sm:$0xff] }
 0x262   : > { %v1132_v30 = vpop.permute.xlu0 %1131  ;;  %v1826_v56 = vld [vmem:[#allocation2 + $0x60] sm:$0xff]  ;;  %1230 = vst.msk [vmem:[#allocation2 + $0xf0] sm:$0xff] %vm1199_vm6, %v1164_v51  ;;  %2639 = vmatprep.mubr.msk.f32.mxu1 %vm1858_vm10, %v1842_v6 }
 0x263   : > { %1214 = vst.msk [vmem:[#allocation2 + $0x70] sm:$0xff] %vm1199_vm6, %v1132_v30  ;;  %2615 = vmatprep.mubr.msk.f32.mxu0 %vm1858_vm10, %v1826_v56 }
 0x265   : > { %v1744_v57 = vpop.permute.xlu1 %1743 }
 0x266   : > { %v1712_v28 = vpop.permute.xlu0 %1711  ;;  %1811 = vst.msk [vmem:[#allocation2 + $0xe8] sm:$0xff] %vm1781_vm9, %v1744_v57 }
 0x267   : > { %1795 = vst.msk [vmem:[#allocation2 + $0x68] sm:$0xff] %vm1781_vm9, %v1712_v28 }
 0x269   : > { %v1166_v31 = vpop.permute.xlu1 %1165 }
 0x26a   : > { %v1134_v0 = vpop.permute.xlu0 %1133  ;;  %1231 = vst.msk [vmem:[#allocation2 + $0xf8] sm:$0xff] %vm1199_vm6, %v1166_v31 }
 0x26b   : > { %1215 = vst.msk [vmem:[#allocation2 + $0x78] sm:$0xff] %vm1199_vm6, %v1134_v0 }
 0x26d   : > { %v1360_v2 = vpop.permute.xlu1 %1359  ;;  %v1843_v34 = vld [vmem:[#allocation2 + $0xe8] sm:$0xff] }
 0x26e   : > { %v1328_v32 = vpop.permute.xlu0 %1327  ;;  %v1827_v33 = vld [vmem:[#allocation2 + $0x68] sm:$0xff]  ;;  %1426 = vst.msk [vmem:[#allocation2 + $0xf0] sm:$0xff] %vm1395_vm7, %v1360_v2  ;;  %2640 = vmatmul.mubr.msk.f32.gmra.mxu1 %vm1858_vm10, %v1843_v34 }
 0x26f   : > { %1410 = vst.msk [vmem:[#allocation2 + $0x70] sm:$0xff] %vm1395_vm7, %v1328_v32  ;;  %2616 = vmatmul.mubr.msk.f32.gmra.mxu0 %vm1858_vm10, %v1827_v33 }
 0x271   : > { %v1362_v35 = vpop.permute.xlu1 %1361 }
 0x272   : > { %v1330_v8 = vpop.permute.xlu0 %1329  ;;  %1427 = vst.msk [vmem:[#allocation2 + $0xf8] sm:$0xff] %vm1395_vm7, %v1362_v35  ;;  %v2602_v9 = vpop.f32.mrf.mxu0 }
 0x273   : > { %1411 = vst.msk [vmem:[#allocation2 + $0x78] sm:$0xff] %vm1395_vm7, %v1330_v8  ;;  %v2626_v53 = vpop.f32.mrf.mxu1  ;;  %v2041_v10 = vadd.f32 %v2602_v9, %v3767_v63 }
 0x274   : > { %v2121_v52 = vadd.f32 %v2626_v53, %v3767_v63  ;;  %v2035_v11 = vpop.f32.mrf.mxu0 }
 0x275   : > { %v2115_v45 = vpop.f32.mrf.mxu1  ;;  %2187 = vst [vmem:[%s3774_s20 + $0x18] sm:$0xff] %v2041_v10  ;;  %v2036_v14 = vadd.f32 %v3767_v63, %v2035_v11  ;;  %v1553_v15 = vpop.permute.xlu1 %1552 }
 0x276   : > { %2203 = vst [vmem:[%s3774_s20 + $0x98] sm:$0xff] %v2121_v52  ;;  %v2116_v25 = vadd.f32 %v3767_v63, %v2115_v45  ;;  %v1521_v44 = vpop.permute.xlu0 %1520  ;;  %1619 = vst.msk [vmem:[#allocation2 + $0xf0] sm:$0xff] %vm1588_vm8, %v1553_v15 }
 0x277   : > { %1603 = vst.msk [vmem:[#allocation2 + $0x70] sm:$0xff] %vm1588_vm8, %v1521_v44  ;;  %2186 = vst [vmem:[%s3774_s20 + $0x10] sm:$0xff] %v2036_v14 }
 0x278   : > { %2202 = vst [vmem:[%s3774_s20 + $0x90] sm:$0xff] %v2116_v25 }
 0x279   : > { %v1555_v42 = vpop.permute.xlu1 %1554 }
 0x27a   : > { %v1523_v24 = vpop.permute.xlu0 %1522  ;;  %1620 = vst.msk [vmem:[#allocation2 + $0xf8] sm:$0xff] %vm1588_vm8, %v1555_v42 }
 0x27b   : > { %1604 = vst.msk [vmem:[#allocation2 + $0x78] sm:$0xff] %vm1588_vm8, %v1523_v24 }
 0x27d   : > { %v1746_v43 = vpop.permute.xlu1 %1745 }
 0x27e   : > { %v1714_v17 = vpop.permute.xlu0 %1713  ;;  %1812 = vst.msk [vmem:[#allocation2 + $0xf0] sm:$0xff] %vm1781_vm9, %v1746_v43 }
 0x27f   : > { %1796 = vst.msk [vmem:[#allocation2 + $0x70] sm:$0xff] %vm1781_vm9, %v1714_v17 }
 0x281   : > { %v1748_v55 = vpop.permute.xlu1 %1747 }
 0x282   : > { %v1716_v13 = vpop.permute.xlu0 %1715  ;;  %1813 = vst.msk [vmem:[#allocation2 + $0xf8] sm:$0xff] %vm1781_vm9, %v1748_v55 }
 0x283   : > { %1797 = vst.msk [vmem:[#allocation2 + $0x78] sm:$0xff] %vm1781_vm9, %v1716_v13 }
 0x285   : > { %v1844_v20 = vld [vmem:[#allocation2 + $0xf0] sm:$0xff] }
 0x286   : > { %v1828_v54 = vld [vmem:[#allocation2 + $0x70] sm:$0xff]  ;;  %2642 = vmatprep.mubr.msk.f32.mxu1 %vm1858_vm10, %v1844_v20 }
 0x287   : > { %2618 = vmatprep.mubr.msk.f32.mxu0 %vm1858_vm10, %v1828_v54 }
 0x289   : > { %v1845_v19 = vld [vmem:[#allocation2 + $0xf8] sm:$0xff] }
 0x28a   : > { %v1829_v39 = vld [vmem:[#allocation2 + $0x78] sm:$0xff]  ;;  %2643 = vmatmul.mubr.msk.f32.gmra.mxu1 %vm1858_vm10, %v1845_v19 }
 0x28b   : > { %2619 = vmatmul.mubr.msk.f32.gmra.mxu0 %vm1858_vm10, %v1829_v39 }
 0x296   : > { %v2605_v5 = vpop.f32.mrf.mxu0 }
 0x297   : > { %v2629_v38 = vpop.f32.mrf.mxu1  ;;  %v2051_v36 = vadd.f32 %v2605_v5, %v3767_v63 }
 0x298   : > { %v2131_v4 = vadd.f32 %v2629_v38, %v3767_v63  ;;  %v2045_v47 = vpop.f32.mrf.mxu0 }
 0x299   : > { %v2125_v37 = vpop.f32.mrf.mxu1  ;;  %2189 = vst [vmem:[%s3774_s20 + $0x28] sm:$0xff] %v2051_v36  ;;  %v2046_v61 = vadd.f32 %v3767_v63, %v2045_v47 }
 0x29a   : > { %2205 = vst [vmem:[%s3774_s20 + $0xa8] sm:$0xff] %v2131_v4  ;;  %v2126_v62 = vadd.f32 %v3767_v63, %v2125_v37 }
 0x29b   : > { %2188 = vst [vmem:[%s3774_s20 + $0x20] sm:$0xff] %v2046_v61 }
 0x29c   : > { %2204 = vst [vmem:[%s3774_s20 + $0xa0] sm:$0xff] %v2126_v62 }
 0x2ba   : > { %v2608_v12 = vpop.f32.mrf.mxu0 }
 0x2bb   : > { %v2632_v16 = vpop.f32.mrf.mxu1  ;;  %v2061_v46 = vadd.f32 %v2608_v12, %v3767_v63 }
 0x2bc   : > { %v2141_v49 = vadd.f32 %v2632_v16, %v3767_v63  ;;  %v2055_v3 = vpop.f32.mrf.mxu0 }
 0x2bd   : > { %v2135_v27 = vpop.f32.mrf.mxu1  ;;  %2191 = vst [vmem:[%s3774_s20 + $0x38] sm:$0xff] %v2061_v46  ;;  %v2056_v29 = vadd.f32 %v3767_v63, %v2055_v3 }
 0x2be   : > { %2207 = vst [vmem:[%s3774_s20 + $0xb8] sm:$0xff] %v2141_v49  ;;  %v2136_v48 = vadd.f32 %v3767_v63, %v2135_v27 }
 0x2bf   : > { %2190 = vst [vmem:[%s3774_s20 + $0x30] sm:$0xff] %v2056_v29 }
 0x2c0   : > { %2206 = vst [vmem:[%s3774_s20 + $0xb0] sm:$0xff] %v2136_v48 }
 0x2de   : > { %v2635_v26 = vpop.f32.mrf.mxu1 }
 0x2df   : > { %v2611_v21 = vpop.f32.mrf.mxu0  ;;  %v2151_v60 = vadd.f32 %v2635_v26, %v3767_v63 }
 0x2e0   : > { %v2071_v59 = vadd.f32 %v2611_v21, %v3767_v63  ;;  %v2145_v18 = vpop.f32.mrf.mxu1 }
 0x2e1   : > { %v2065_v1 = vpop.f32.mrf.mxu0  ;;  %2209 = vst [vmem:[%s3774_s20 + $0xc8] sm:$0xff] %v2151_v60  ;;  %v2146_v23 = vadd.f32 %v3767_v63, %v2145_v18 }
 0x2e2   : > { %2193 = vst [vmem:[%s3774_s20 + $0x48] sm:$0xff] %v2071_v59  ;;  %v2066_v58 = vadd.f32 %v3767_v63, %v2065_v1 }
 0x2e3   : > { %2208 = vst [vmem:[%s3774_s20 + $0xc0] sm:$0xff] %v2146_v23 }
 0x2e4   : > { %2192 = vst [vmem:[%s3774_s20 + $0x40] sm:$0xff] %v2066_v58 }
 0x306   : > { %v2638_v50 = vpop.f32.mrf.mxu1 }
 0x307   : > { %v2614_v41 = vpop.f32.mrf.mxu0  ;;  %v2161_v40 = vadd.f32 %v2638_v50, %v3767_v63 }
 0x308   : > { %v2081_v22 = vadd.f32 %v2614_v41, %v3767_v63  ;;  %v2155_v51 = vpop.f32.mrf.mxu1 }
 0x309   : > { %v2075_v7 = vpop.f32.mrf.mxu0  ;;  %2211 = vst [vmem:[%s3774_s20 + $0xd8] sm:$0xff] %v2161_v40  ;;  %v2156_v56 = vadd.f32 %v3767_v63, %v2155_v51 }
 0x30a   : > { %2195 = vst [vmem:[%s3774_s20 + $0x58] sm:$0xff] %v2081_v22  ;;  %v2076_v30 = vadd.f32 %v3767_v63, %v2075_v7 }
 0x30b   : > { %2210 = vst [vmem:[%s3774_s20 + $0xd0] sm:$0xff] %v2156_v56 }
 0x30c   : > { %2194 = vst [vmem:[%s3774_s20 + $0x50] sm:$0xff] %v2076_v30 }
 0x32e   : > { %v2641_v57 = vpop.f32.mrf.mxu1 }
 0x32f   : > { %v2617_v6 = vpop.f32.mrf.mxu0  ;;  %v2171_v31 = vadd.f32 %v2641_v57, %v3767_v63 }
 0x330   : > { %v2091_v28 = vadd.f32 %v2617_v6, %v3767_v63  ;;  %v2165_v2 = vpop.f32.mrf.mxu1 }
 0x331   : > { %v2085_v0 = vpop.f32.mrf.mxu0  ;;  %2213 = vst [vmem:[%s3774_s20 + $0xe8] sm:$0xff] %v2171_v31  ;;  %v2166_v33 = vadd.f32 %v3767_v63, %v2165_v2 }
 0x332   : > { %2197 = vst [vmem:[%s3774_s20 + $0x68] sm:$0xff] %v2091_v28  ;;  %v2086_v32 = vadd.f32 %v3767_v63, %v2085_v0 }
 0x333   : > { %2212 = vst [vmem:[%s3774_s20 + $0xe0] sm:$0xff] %v2166_v33 }
 0x334   : > { %2196 = vst [vmem:[%s3774_s20 + $0x60] sm:$0xff] %v2086_v32 }
 0x34a   : > { %v2644_v35 = vpop.f32.mrf.mxu1 }
 0x34b   : > { %v2620_v34 = vpop.f32.mrf.mxu0  ;;  %v2181_v9 = vadd.f32 %v2644_v35, %v3767_v63 }
 0x34c   : > { %v2101_v8 = vadd.f32 %v2620_v34, %v3767_v63  ;;  %v2175_v10 = vpop.f32.mrf.mxu1 }
 0x34d   : > { %v2095_v53 = vpop.f32.mrf.mxu0  ;;  %2215 = vst [vmem:[%s3774_s20 + $0xf8] sm:$0xff] %v2181_v9  ;;  %v2176_v11 = vadd.f32 %v3767_v63, %v2175_v10 }
 0x34e   : > { %2199 = vst [vmem:[%s3774_s20 + $0x78] sm:$0xff] %v2101_v8  ;;  %v2096_v52 = vadd.f32 %v3767_v63, %v2095_v53 }
 0x34f   : > { %2214 = vst [vmem:[%s3774_s20 + $0xf0] sm:$0xff] %v2176_v11 }
 0x350   : > { %2198 = vst [vmem:[%s3774_s20 + $0x70] sm:$0xff] %v2096_v52 }
 0x351 PF: > { %s13_s14 = sadd.s32 1, %s2710_s14   ;;  %s3918_s12 = smov %s2706_s13 }
 0x352   : > { %p10_p5 = scmp.ge.s32.totalorder %s13_s14, 4   ;;  %s3919_s13 = smov %s3921_s15 }
 0x354   :  { %12 = sbr.rel (!%p10_p5) target bundleno = 2 (0x2), region = 65 }

</bundles_post_ra>
